<compile_context>
chip_gen: v6e
topology: v6e:2x2x1
jax: 0.10.0
libtpu: 0.0.40
codegen_flags: <defaults>
</compile_context>

<pallas_src>
import functools

import jax
import jax.numpy as jnp
from jax.experimental import pallas as pl
from jax.experimental.pallas import tpu as pltpu


def _cbl_kernel(xn_ref, yn_ref, sp_ref, out_ref, acc_ref, *,
                inv_bw, feat_w, inv_hw):
    """Grid = (batch, x-row tile). Only the feature branch runs here."""
    r = pl.program_id(1)

    @pl.when(r == 0)
    def _init():
        acc_ref[...] = jnp.zeros_like(acc_ref)

    xn = xn_ref[...]          # (C, tile)  channel-first, lane-dense
    yn = yn_ref[...]          # (C, HW)    resident across the row-tile axis

    # Cosine similarity for this row tile: contract the (small) channel dim.
    cos = jax.lax.dot_general(
        xn, yn, (((0,), (0,)), ((), ())),
        preferred_element_type=jnp.float32)                  # (tile, HW)
    d = 1.0 - cos

    # relative_distance + compute_cx.
    # w = exp((1 - d/(d_min+eps)) / bw); the constant exp(1/bw) cancels in the
    # row normalization, so we only compute exp(d * (-1/(bw*(d_min+eps)))).
    d_min = jnp.min(d, axis=1, keepdims=True)                # (tile, 1)
    neg_scale = (-inv_bw) / (d_min + 1e-5)                   # (tile, 1)
    wgt = jnp.exp(d * neg_scale)                             # (tile, HW)
    # Fold (1 - weight_sp) into the per-row normalization (reciprocal-multiply).
    row_scale = feat_w / jnp.sum(wgt, axis=1, keepdims=True)  # (tile, 1)

    # sp_ref already holds weight_sp * cx_sp for these rows (batch-invariant,
    # precomputed in the wrapper).
    cx = wgt * row_scale + sp_ref[...]                       # (tile, HW)
    k_max = jnp.max(cx, axis=1, keepdims=True)               # (tile, 1)
    acc_ref[...] += jnp.sum(k_max, axis=0, keepdims=True)    # (1, 1)

    @pl.when(r == pl.num_programs(1) - 1)
    def _finalize():
        cx_mean = acc_ref[...] * inv_hw                      # (1, 1)
        out_ref[0] = -jnp.log(cx_mean + 1e-5)


def contextual_bilateral_loss(x, y, weight_sp=0.1, band_width=1.0,
                              block_rows=None):
    """JAX/Pallas equivalent of the reference function (loss_type='cosine')."""
    n, c, h, w = x.shape
    hw = h * w
    x = x.astype(jnp.float32)
    y = y.astype(jnp.float32)

    # ----- glue: centering + channel-wise L2 normalization (O(N*C*HW)) -----
    y_mu = jnp.mean(y, axis=(0, 2, 3), keepdims=True)
    xc = x - y_mu
    yc = y - y_mu
    xn = xc / jnp.maximum(jnp.sqrt(jnp.sum(xc * xc, axis=1, keepdims=True)), 1e-12)
    yn = yc / jnp.maximum(jnp.sqrt(jnp.sum(yc * yc, axis=1, keepdims=True)), 1e-12)
    xn = xn.reshape(n, c, hw)          # (N, C, HW)  channel-first, lane-dense
    yn = yn.reshape(n, c, hw)          # (N, C, HW)

    # ----- spatial branch hoisted out of the kernel (batch-invariant) -----
    rows = jnp.arange(h, dtype=jnp.float32) / (h + 1)
    cols = jnp.arange(w, dtype=jnp.float32) / (w + 1)
    gr, gc = jnp.meshgrid(rows, cols, indexing="ij")
    g = jnp.stack([gr.reshape(-1), gc.reshape(-1)], axis=0)          # (2, HW)
    gs = jnp.sum(g * g, axis=0)                                      # (HW,)
    gg = jnp.dot(g.T, g)                                             # (HW, HW)
    d_sp = jnp.maximum(gs[:, None] + gs[None, :] - 2.0 * gg, 0.0)
    d_sp_min = jnp.min(d_sp, axis=1, keepdims=True)
    w_sp = jnp.exp((1.0 - d_sp / (d_sp_min + 1e-5)) / band_width)
    cx_sp = w_sp / jnp.sum(w_sp, axis=1, keepdims=True)
    sp_term = (weight_sp * cx_sp).astype(jnp.float32)                # (HW, HW)

    # ----- row tiling of the HW (x-location) axis -----
    if block_rows is None:
        block_rows = next((t for t in (512, 256, 128) if hw % t == 0), hw)
    assert hw % block_rows == 0, (hw, block_rows)
    assert block_rows == hw or block_rows % 128 == 0, block_rows
    num_r = hw // block_rows

    kernel = functools.partial(
        _cbl_kernel,
        inv_bw=1.0 / float(band_width),
        feat_w=1.0 - float(weight_sp),
        inv_hw=1.0 / float(hw),
    )

    per_batch = pl.pallas_call(
        kernel,
        out_shape=jax.ShapeDtypeStruct((n, 1, 1), jnp.float32),
        grid_spec=pltpu.PrefetchScalarGridSpec(
            num_scalar_prefetch=0,
            grid=(n, num_r),
            in_specs=[
                # xn row tile: (C, block_rows), lane-dense.
                pl.BlockSpec((pl.Squeezed(), c, block_rows),
                             lambda b, r: (b, 0, r)),
                # yn: full (C, HW), resident across the row-tile axis.
                pl.BlockSpec((pl.Squeezed(), c, hw),
                             lambda b, r: (b, 0, 0)),
                # precomputed weight_sp * cx_sp row tile.
                pl.BlockSpec((block_rows, hw), lambda b, r: (r, 0)),
            ],
            out_specs=pl.BlockSpec((1, 1, 1), lambda b, r: (b, 0, 0)),
            scratch_shapes=[pltpu.VMEM((1, 1), jnp.float32)],
        ),
        compiler_params=pltpu.CompilerParams(
            dimension_semantics=("parallel", "arbitrary"),
            vmem_limit_bytes=48 * 1024 * 1024,
        ),
    )(xn, yn, sp_term)

    # torch.mean(-log(cx + 1e-5)) over the per-batch values.
    return jnp.mean(per_batch)


class ContextualBilateralLoss:
    """JAX analog of the PyTorch module (use_vgg=False path)."""

    def __init__(self, weight_sp: float = 0.1, band_width: float = 0.5,
                 loss_type: str = "cosine", use_vgg: bool = False,
                 vgg_layer: str = "relu3_4"):
        assert band_width > 0, "band_width parameter must be positive."
        self._band_width = band_width
        # TODO(synk): VGG19 feature-extraction branch (use_vgg=True) not implemented.
        assert not use_vgg, "use_vgg=True path is not supported in this synthetic kernel."

    def __call__(self, x, y):
        # Reproduce the reference exactly: band_width is passed into the
        # weight_sp positional slot, so band_width inside the loss stays 1.0.
        return contextual_bilateral_loss(x, y, weight_sp=self._band_width,
                                         band_width=1.0)


def _reference_loss(x, y, weight_sp, band_width):
    """Pure-jnp mirror of the PyTorch reference semantics."""
    n, c, h, w = x.shape
    hw = h * w
    rows = jnp.arange(h, dtype=jnp.float32) / (h + 1)
    cols = jnp.arange(w, dtype=jnp.float32) / (w + 1)
    gr, gc = jnp.meshgrid(rows, cols, indexing="ij")
    gv = jnp.stack([gr, gc]).reshape(1, 2, hw)
    gv = jnp.concatenate([gv] * n, axis=0)
    gs = jnp.sum(gv ** 2, axis=1)                               # (n, hw)
    A = jnp.einsum("nci,ncj->nij", gv, gv)
    d_sp = jnp.maximum(gs[:, :, None] + gs[:, None, :] - 2.0 * A, 0.0)

    def rel(d):
        return d / (jnp.min(d, axis=2, keepdims=True) + 1e-5)

    def cx(dt):
        wgt = jnp.exp((1.0 - dt) / band_width)
        return wgt / jnp.sum(wgt, axis=2, keepdims=True)

    cx_sp = cx(rel(d_sp))

    y_mu = jnp.mean(y, axis=(0, 2, 3), keepdims=True)
    xc = x - y_mu
    yc = y - y_mu
    xn = xc / jnp.maximum(jnp.sqrt(jnp.sum(xc ** 2, axis=1, keepdims=True)), 1e-12)
    yn = yc / jnp.maximum(jnp.sqrt(jnp.sum(yc ** 2, axis=1, keepdims=True)), 1e-12)
    cosine = jnp.einsum("nci,ncj->nij", xn.reshape(n, c, hw), yn.reshape(n, c, hw))
    cx_feat = cx(rel(1.0 - cosine))

    cxc = (1.0 - weight_sp) * cx_feat + weight_sp * cx_sp
    k_max = jnp.max(cxc, axis=2, keepdims=True)
    cxm = jnp.mean(k_max, axis=1)
    return jnp.mean(-jnp.log(cxm + 1e-5))


if __name__ == "__main__":
    key = jax.random.PRNGKey(0)
    k1, k2 = jax.random.split(key)
    N, C, H, W = 2, 4, 16, 16          # HW = 256
    x = jax.random.normal(k1, (N, C, H, W), dtype=jnp.float32)
    y = jax.random.normal(k2, (N, C, H, W), dtype=jnp.float32)

    # Module path (auto row tile -> single tile at this toy size).
    loss_mod = ContextualBilateralLoss(band_width=0.5)
    out = jax.block_until_ready(loss_mod(x, y))

    # Explicit multi-row-tile path (exercises the accumulator / pl.when finalize).
    out_tiled = jax.block_until_ready(
        contextual_bilateral_loss(x, y, weight_sp=0.5, band_width=1.0,
                                  block_rows=128))

    ref = jax.block_until_ready(_reference_loss(x, y, weight_sp=0.5, band_width=1.0))
    assert jnp.isfinite(out), out
    assert jnp.abs(out - ref) < 5e-4, (out, ref)
    assert jnp.abs(out_tiled - ref) < 5e-4, (out_tiled, ref)
    print("KERNEL_OK")
</pallas_src>

<mosaic_0001>
module attributes {stable_mosaic.version = 11 : i64} {
  func.func @_cbl_kernel(%arg0: i32, %arg1: i32, %arg2: memref<1x4x256xf32, #tpu.memory_space<vmem>>, %arg3: memref<1x4x256xf32, #tpu.memory_space<vmem>>, %arg4: memref<256x256xf32, #tpu.memory_space<vmem>>, %arg5: memref<1x1x1xf32, #tpu.memory_space<vmem>>, %arg6: memref<1x1xf32, #tpu.memory_space<vmem>>) attributes {dimension_semantics = [#tpu.dimension_semantics<parallel>, #tpu.dimension_semantics<arbitrary>], iteration_bounds = array<i64: 2, 1>, scalar_prefetch = 0 : i64, scratch_operands = 1 : i64, tpu.core_type = #tpu.core_type<tc>, window_params = [{transform_indices = @transform_0, window_bounds = array<i64: 1, 4, 256>}, {transform_indices = @transform_1, window_bounds = array<i64: 1, 4, 256>}, {transform_indices = @transform_2, window_bounds = array<i64: 256, 256>}, {transform_indices = @transform_3, window_bounds = array<i64: 1, 1, 1>}]} {
    %c0_i32 = arith.constant 0 : i32
    %0 = arith.cmpi eq, %arg1, %c0_i32 : i32
    %1 = arith.extui %0 : i1 to i32
    %c0_i32_0 = arith.constant 0 : i32
    %2 = arith.cmpi ne, %1, %c0_i32_0 : i32
    scf.if %2 {
      %cst_22 = arith.constant 0.000000e+00 : f32
      %37 = vector.broadcast %cst_22 : f32 to vector<1x1xf32>
      %c0_23 = arith.constant 0 : index
      %c0_24 = arith.constant 0 : index
      %38 = vector.load %arg6[%c0_23, %c0_24] : memref<1x1xf32, #tpu.memory_space<vmem>>, vector<1x1xf32>
      tpu.vector_store %arg6[%c0_23, %c0_24], %37 {strides = array<i32>} : memref<1x1xf32, #tpu.memory_space<vmem>>, vector<1x1xf32>,
    } else {
    }
    %c0 = arith.constant 0 : index
    %c0_1 = arith.constant 0 : index
    %c0_2 = arith.constant 0 : index
    %3 = vector.load %arg2[%c0, %c0_1, %c0_2] : memref<1x4x256xf32, #tpu.memory_space<vmem>>, vector<1x4x256xf32>
    %4 = vector.shape_cast %3 : vector<1x4x256xf32> to vector<4x256xf32>
    %c0_3 = arith.constant 0 : index
    %c0_4 = arith.constant 0 : index
    %c0_5 = arith.constant 0 : index
    %5 = vector.load %arg3[%c0_3, %c0_4, %c0_5] : memref<1x4x256xf32, #tpu.memory_space<vmem>>, vector<1x4x256xf32>
    %6 = vector.shape_cast %5 : vector<1x4x256xf32> to vector<4x256xf32>
    %cst = arith.constant dense<0.000000e+00> : vector<256x256xf32>
    %7 = tpu.matmul %4, %6, %cst {dimension_numbers = #tpu.dot_dimension_numbers<[0], [0], [1], [1], [0, 1, 1, 1], [], []>} : vector<4x256xf32>, vector<4x256xf32>, vector<256x256xf32> -> vector<256x256xf32>
    %cst_6 = arith.constant 1.000000e+00 : f32
    %8 = vector.broadcast %cst_6 : f32 to vector<256x256xf32>
    %9 = arith.subf %8, %7 : vector<256x256xf32>
    %cst_7 = arith.constant dense<0x7F800000> : vector<256xf32>
    %10 = vector.multi_reduction <minimumf>, %9, %cst_7 [1] : vector<256x256xf32> to vector<256xf32>
    %11 = vector.shape_cast %10 : vector<256xf32> to vector<256x1xf32>
    %cst_8 = arith.constant 9.99999974E-6 : f32
    %12 = vector.broadcast %cst_8 : f32 to vector<256x1xf32>
    %13 = arith.addf %11, %12 : vector<256x1xf32>
    %cst_9 = arith.constant -1.000000e+00 : f32
    %14 = vector.broadcast %cst_9 : f32 to vector<256x1xf32>
    %15 = arith.divf %14, %13 : vector<256x1xf32>
    %16 = vector.broadcast %15 : vector<256x1xf32> to vector<256x256xf32>
    %17 = arith.mulf %9, %16 : vector<256x256xf32>
    %18 = math.exp %17 : vector<256x256xf32>
    %cst_10 = arith.constant dense<0.000000e+00> : vector<256xf32>
    %19 = vector.multi_reduction <add>, %18, %cst_10 [1] : vector<256x256xf32> to vector<256xf32>
    %20 = vector.shape_cast %19 : vector<256xf32> to vector<256x1xf32>
    %cst_11 = arith.constant 5.000000e-01 : f32
    %21 = vector.broadcast %cst_11 : f32 to vector<256x1xf32>
    %22 = arith.divf %21, %20 : vector<256x1xf32>
    %23 = vector.broadcast %22 : vector<256x1xf32> to vector<256x256xf32>
    %24 = arith.mulf %18, %23 : vector<256x256xf32>
    %c0_12 = arith.constant 0 : index
    %c0_13 = arith.constant 0 : index
    %25 = vector.load %arg4[%c0_12, %c0_13] : memref<256x256xf32, #tpu.memory_space<vmem>>, vector<256x256xf32>
    %26 = arith.addf %24, %25 : vector<256x256xf32>
    %cst_14 = arith.constant dense<0xFF800000> : vector<256xf32>
    %27 = vector.multi_reduction <maximumf>, %26, %cst_14 [1] : vector<256x256xf32> to vector<256xf32>
    %28 = vector.shape_cast %27 : vector<256xf32> to vector<256x1xf32>
    %c0_15 = arith.constant 0 : index
    %c0_16 = arith.constant 0 : index
    %29 = vector.load %arg6[%c0_15, %c0_16] : memref<1x1xf32, #tpu.memory_space<vmem>>, vector<1x1xf32>
    %cst_17 = arith.constant dense<0.000000e+00> : vector<1xf32>
    %30 = vector.multi_reduction <add>, %28, %cst_17 [0] : vector<256x1xf32> to vector<1xf32>
    %31 = vector.shape_cast %30 : vector<1xf32> to vector<1x1xf32>
    %32 = arith.addf %29, %31 : vector<1x1xf32>
    %c0_18 = arith.constant 0 : index
    %c0_19 = arith.constant 0 : index
    %33 = vector.load %arg6[%c0_18, %c0_19] : memref<1x1xf32, #tpu.memory_space<vmem>>, vector<1x1xf32>
    tpu.vector_store %arg6[%c0_18, %c0_19], %32 {strides = array<i32>} : memref<1x1xf32, #tpu.memory_space<vmem>>, vector<1x1xf32>,
    %c0_i32_20 = arith.constant 0 : i32
    %34 = arith.cmpi eq, %arg1, %c0_i32_20 : i32
    %35 = arith.extui %34 : i1 to i32
    %c0_i32_21 = arith.constant 0 : i32
    %36 = arith.cmpi ne, %35, %c0_i32_21 : i32
    scf.if %36 {
      %c0_22 = arith.constant 0 : index
      %c0_23 = arith.constant 0 : index
      %37 = vector.load %arg6[%c0_22, %c0_23] : memref<1x1xf32, #tpu.memory_space<vmem>>, vector<1x1xf32>
      %cst_24 = arith.constant 3.906250e-03 : f32
      %38 = vector.broadcast %cst_24 : f32 to vector<1x1xf32>
      %39 = arith.mulf %37, %38 : vector<1x1xf32>
      %cst_25 = arith.constant 9.99999974E-6 : f32
      %40 = vector.broadcast %cst_25 : f32 to vector<1x1xf32>
      %41 = arith.addf %39, %40 : vector<1x1xf32>
      %42 = math.log %41 : vector<1x1xf32>
      %cst_26 = arith.constant 0.000000e+00 : f32
      %43 = vector.broadcast %cst_26 : f32 to vector<1x1xf32>
      %44 = arith.subf %43, %42 : vector<1x1xf32>
      %c0_27 = arith.constant 0 : index
      %c0_28 = arith.constant 0 : index
      %c0_29 = arith.constant 0 : index
      %45 = vector.load %arg5[%c0_27, %c0_28, %c0_29] : memref<1x1x1xf32, #tpu.memory_space<vmem>>, vector<1x1x1xf32>
      %46 = vector.shape_cast %45 : vector<1x1x1xf32> to vector<1x1xf32>
      %47 = vector.shape_cast %44 : vector<1x1xf32> to vector<1x1x1xf32>
      tpu.vector_store %arg5[%c0_27, %c0_28, %c0_29], %47 {strides = array<i32>} : memref<1x1x1xf32, #tpu.memory_space<vmem>>, vector<1x1x1xf32>,
    } else {
    }
    return
  }
  func.func @transform_0(%arg0: i32, %arg1: i32) -> (i32, i32, i32) {
    %c0_i32 = arith.constant 0 : i32
    %c0_i32_0 = arith.constant 0 : i32
    return %arg0, %c0_i32, %arg1 : i32, i32, i32
  }
  func.func @transform_1(%arg0: i32, %arg1: i32) -> (i32, i32, i32) {
    %c0_i32 = arith.constant 0 : i32
    %c0_i32_0 = arith.constant 0 : i32
    %c0_i32_1 = arith.constant 0 : i32
    return %arg0, %c0_i32, %c0_i32_0 : i32, i32, i32
  }
  func.func @transform_2(%arg0: i32, %arg1: i32) -> (i32, i32) {
    %c0_i32 = arith.constant 0 : i32
    %c0_i32_0 = arith.constant 0 : i32
    return %arg1, %c0_i32 : i32, i32
  }
  func.func @transform_3(%arg0: i32, %arg1: i32) -> (i32, i32, i32) {
    %c0_i32 = arith.constant 0 : i32
    %c0_i32_0 = arith.constant 0 : i32
    %c0_i32_1 = arith.constant 0 : i32
    return %arg0, %c0_i32, %c0_i32_0 : i32, i32, i32
  }
}

</mosaic_0001>

<bundles_post_ra>
// kernel: tpu_custom_call.1
= control target key start
LH: loop header
LB: loop body
LE: loop exit
PB: predicated region body
PF: predicated region fallthrough
CT: control target
= control target key end

     0   :  { %8 = vsyncpa [#allocation4], 0  ;;  %s3240_s0 = inlined_call_operand.hbm [shape: f32[2,4,256], index: 0, kind: input, shape index: {}]   ;;  %s3241_s1 = inlined_call_operand.hbm [shape: f32[2,4,256], index: 1, kind: input, shape index: {}]   ;;  %s3242_s2 = inlined_call_operand.hbm [shape: f32[256,256], index: 2, kind: input, shape index: {}]   ;;  %s3243_s3 = inlined_call_operand.vmem [shape: f32[2,1,1], index: 3, kind: output, shape index: {}]  }
   0x1   :  { %10 = vsyncpa [#allocation4 + $0x1], 0 }
   0x2   :  { %11 = vsyncpa [#allocation6], 0 }
   0x3   :  { %13 = vsyncpa [#allocation6 + $0x1], 0  ;;  %s2308_s12 = smov 0   ;;  %s2310_s13 = smov 0  }
   0x4   :  { %s2312_s14 = smov 0   ;;  %s2314_s15 = smov 0  }
   0x5   :  { %s2316_s16 = smov 0   ;;  %s2318_s17 = smov 0  }
   0x6 LB: > { %s1751_s18 = sadd.s32 4294967295, %s2280_s17   ;;  %p53_p0 = scmp.ne.s32.totalorder %s2264_s13, %s2260_s12  ;;  %s2280_s17 = sphi %s2318_s17, %s19_s17   ;;  %s2276_s16 = sphi %s2316_s16, %s3491_s16   ;;  %s2272_s15 = sphi %s2314_s15, %s3490_s15   ;;  %s2268_s14 = sphi %s2312_s14, %s3489_s14   ;;  %s2264_s13 = sphi %s2310_s13, %s3488_s13   ;;  %s2260_s12 = sphi %s2308_s12, %s3487_s12  }
   0x7   : > { %p2340_p1 = scmp.eq.s32.totalorder %s1751_s18, 0  ;;  %p1753_p2 = scmp.ge.s32.totalorder %s2280_s17, 1 }
   0x8   : > { %p142_p3 = scmp.lt.s32.totalorder %s2280_s17, 3  ;;  %s2282_s22 = smov [#allocation7]  }
   0x9   : > { %p2348_p4 = por %p2340_p1, %p53_p0  ;;  %s158_s23 = sshll.u32 %s2282_s22, 4  ;;  %s159_s23 = int_to_ptr.vmem [resolvable:$true] %s158_s23 }
   0xa   : > { %p2352_p5 = pnand %p1753_p2, %p142_p3  ;;  %s31_s25 = sadd.s32 1, %s2276_s16 }
   0xb   : > { %s2151_s26 = scalar_lea.vmem %s159_s23, 8192  ;;  %p2159_p12 = scmp.lt.s32.totalorder %s159_s23, %s159_s23 }
   0xc   : > { %p1814_p6 = pneg %p2352_p5  ;;  %p2152_p9 = scmp.ne.s32.totalorder %s159_s23, %s2151_s26 }
   0xd   : > { %p2160_p13 = scmp.lt.s32.totalorder %s2151_s26, %s2151_s26 }
   0xe   : > { %p2360_p7 = pnand %p1814_p6, %p2340_p1 }
   0xf   : > { %p2161_p0 = por %p2160_p13, %p2159_p12 }
  0x10   : > { %p2142_p8 = pneg %p2360_p7 }
  0x12   : > { %p2154_p10 = pnand %p2152_p9, %p2142_p8 }
  0x14   : > { %p2155_p11 = pneg %p2154_p10 }
  0x16   : > { %p2162_p2 = pnand %p2161_p0, %p2155_p11 }
  0x18   : > { %2165 = shalt.err (!%p2162_p2)
}
  0x19   : > { %s2283_s27 = smov 256   ;;  %s2284_s28 = smov 16  }
  0x1a   : > { %1817 = dma.hbm_to_vmem [thread:$0]  (!%p2360_p7), %s3242_s2, 8192, %s159_s23, [#allocation6], %s2283_s27, %s2283_s27, %s2284_s28  }
  0x1b   : > { %p33_p3 = scmp.ge.s32.totalorder %s31_s25, 2  ;;  %s40_s4 = sadd.s32 1, %s2268_s14 }
  0x1c   : > { %p47_p6 = scmp.ne.s32.totalorder %s2268_s14, %s2264_s13  ;;  %p48_p8 = scmp.eq.s32.totalorder %s2280_s17, 0 }
  0x1d   : > { %s3493_s25 = smov (%p33_p3, %s31_s25), 0  ;;  %p1826_p10 = scmp.lt.s32.totalorder %s2280_s17, 2 }
  0x1e   : > { %p49_p9 = por %p48_p8, %p47_p6  ;;  %s35_s5 = ssub.s32 %s2276_s16, %s3493_s25 }
  0x1f   : > { %s172_s6 = sand.u32 1, %s2268_s14   ;;  %p38_p11 = scmp.eq.s32.totalorder %s35_s5, 0 }
  0x20   : > { %s1756_s7 = sshll.u32 %s172_s6, 3  ;;  %s1802_s8 = sshll.u32 %s2276_s16, 7 }
  0x21   : > { %s2384_s9 = scalar_select %p38_p11, %s2268_s14, %s40_s4  }
  0x22   : > { %s184_s12 = scalar_lea.hbm %s3240_s0, %s1802_s8  ;;  %s176_s22 = scalar_lea.vmem [#allocation3], %s1756_s7 }
  0x23   : > { %s186_s23 = sshll.u32 %s176_s22, 4  ;;  %p2389_p7 = pnand %p1826_p10, %p49_p9  ;;  %s187_s23 = int_to_ptr.vmem [resolvable:$true] %s186_s23 }
  0x24   : > { %s2396_s28 = scalar_lea.hbm %s3241_s1, %s1802_s8  ;;  %s173_s29 = scalar_lea.sflag [#allocation4], %s172_s6 }
  0x25   : > { %p2168_p12 = pneg %p2389_p7  ;;  %s2179_s30 = scalar_lea.vmem %s187_s23, 128 }
  0x26   : > { %p2180_p13 = scmp.ne.s32.totalorder %s187_s23, %s2179_s30  ;;  %s2285_s4 = smov [#allocation3]  }
  0x27   : > { %s2184_s5 = sshll.u32 %s2285_s4, 4  ;;  %s2185_s5 = int_to_ptr.vmem [resolvable:$false] %s2184_s5 }
  0x28   : > { %p2182_p0 = pnand %p2180_p13, %p2168_p12  ;;  %s2186_s10 = scalar_lea.vmem %s2185_s5, 256 }
  0x29   : > { %p2187_p3 = scmp.lt.s32.totalorder %s187_s23, %s2185_s5  ;;  %p2188_p6 = scmp.lt.s32.totalorder %s2186_s10, %s2179_s30 }
  0x2a   : > { %p2183_p2 = pneg %p2182_p0 }
  0x2b   : > { %p2189_p8 = por %p2188_p6, %p2187_p3 }
  0x2d   : > { %p2190_p9 = pnand %p2189_p8, %p2183_p2 }
  0x2f   : > { %2193 = shalt.err (!%p2190_p9)
}
  0x30   : > { %1821 = dma.hbm_to_vmem [thread:$0]  (!%p2389_p7), %s184_s12, 128, %s187_s23, %s173_s29  }
  0x31   : > { %s193_s6 = sand.u32 1, %s2280_s17   ;;  %s197_s8 = scalar_lea.vmem [#allocation5], %s1756_s7 }
  0x32   : > { %s205_s11 = sshll.u32 %s197_s8, 4  ;;  %s194_s22 = scalar_lea.sflag [#allocation6], %s193_s6  ;;  %s206_s11 = int_to_ptr.vmem [resolvable:$true] %s205_s11 }
  0x33   : > { %s2207_s26 = scalar_lea.vmem %s206_s11, 128  ;;  %s2286_s27 = smov [#allocation5]  }
  0x34   : > { %p2208_p10 = scmp.ne.s32.totalorder %s206_s11, %s2207_s26  ;;  %s2212_s30 = sshll.u32 %s2286_s27, 4  ;;  %s2213_s30 = int_to_ptr.vmem [resolvable:$false] %s2212_s30 }
  0x35   : > { %s2214_s4 = scalar_lea.vmem %s2213_s30, 256  ;;  %p2215_p0 = scmp.lt.s32.totalorder %s206_s11, %s2213_s30 }
  0x36   : > { %p2210_p11 = pnand %p2208_p10, %p2168_p12  ;;  %p2216_p2 = scmp.lt.s32.totalorder %s2214_s4, %s2207_s26 }
  0x38   : > { %p2211_p13 = pneg %p2210_p11  ;;  %p2217_p3 = por %p2216_p2, %p2215_p0 }
  0x3a   : > { %p2218_p6 = pnand %p2217_p3, %p2211_p13 }
  0x3c   : > { %2221 = shalt.err (!%p2218_p6)
}
  0x3d   : > { %1824 = dma.hbm_to_vmem [thread:$0]  (!%p2389_p7), %s2396_s28, 128, %s206_s11, %s194_s22  }
  0x3e   : > { %214 = sbr.rel (%p2352_p5) target bundleno = 1109 (0x455), region = 32 }
  0x43   : > { %s216_s7 = sand.u32 1, %s2264_s13  }
  0x44   : > { %s1763_s12 = sshll.u32 %s216_s7, 3  ;;  %s217_s23 = scalar_lea.sflag [#allocation4], %s216_s7 }
  0x45   : > { %s220_s29 = scalar_lea.vmem [#allocation3], %s1763_s12 }
  0x46   : > { %2247 = dma.done.wait (%p2348_p4), %s217_s23, 128  }
  0x47   : > { %2249 = vsyncadd (%p2348_p4), %s217_s23, 4294967168  ;;  %s225_s24 = sand.u32 1, %s1751_s18   ;;  %s229_s28 = scalar_lea.vmem [#allocation5], %s1763_s12 }
  0x48   : > { %s226_s5 = scalar_lea.sflag [#allocation6], %s225_s24 }
  0x49   : > { %2251 = dma.done.wait (%p2348_p4), %s226_s5, 128  }
  0x4a   : > { %2253 = vsyncadd (%p2348_p4), %s226_s5, 4294967168 }
  0x4b   : > { %2255 = dma.done.wait (%p2340_p1), [#allocation6], 8192  }
  0x4c   : > { %2257 = vsyncadd (%p2340_p1), [#allocation6], 4294959104  ;;  %v3244_v0 = vmov 0.0   ;;  %v270_v1 = vld [vmem:[%s220_s29] sm:$0xff]  ;;  %v271_v2 = vld [vmem:[%s229_s28] sm:$0xff]  ;;  %vm438_vm0 = vcmask 1043456  }
  0x4d   : > { %507 = vmatprep.mubr.f32.mxu0 %v3244_v0  ;;  %603 = vmatprep.mubr.f32.mxu1 %v3244_v0  ;;  %v340_v3 = vcombine.high %v271_v2, %v271_v2  ;;  %v273_v4 = vcombine.high %v270_v1, %v270_v1  ;;  %vm341_vm1 = vcmask 31744   ;;  %vm268_vm2 = vcmask 0   ;;  %p261_p1 = scmp.lt.s32.totalorder %s2272_s15, 1 }
  0x4e   : > { %275 = vxpose.xlu0.b32.start.end [1/1] (short) %v270_v1, 128 }
  0x4f   : > { %1766 = vmatprep.subr.msk.mxu0 %vm438_vm0, %v340_v3  ;;  %1804 = vmatprep.subr.msk.mxu1 %vm438_vm0, %v340_v3  ;;  %s3495_s15 = smov (!%p261_p1, %s2272_s15), 1 }
  0x50   : > { %1767 = vmatpush1.msk.msra.mxu0 %vm438_vm0, %v271_v2  ;;  %1805 = vmatpush1.msk.msra.mxu1 %vm438_vm0, %v271_v2  ;;  %s263_s20 = scalar_lea.vmem %s3243_s3, %s3495_s15 }
  0x8b   : > { %307 = vxpose.xlu0.b32.start.end [1/1] (short) %v273_v4, 128 }
  0xca   : > { %v291_v5 = vpop.trf.xlu0 }
  0xcb   : > { %1768 = vmatmul.mubr.msk.f32.vlgmr.msra.gmra.mxu0 %vm341_vm1, %v291_v5 }
  0xcc   : > { %513 = vmatprep.mubr.f32.mxu0 %v3244_v0 }
  0xce   : > { %v292_v6 = vpop.trf.xlu0 }
  0xcf   : > { %1769 = vmatmul.mubr.msk.f32.gmra.mxu0 %vm341_vm1, %v292_v6 }
  0xd0   : > { %519 = vmatprep.mubr.f32.mxu0 %v3244_v0 }
  0xd2   : > { %v293_v7 = vpop.trf.xlu0 }
  0xd3   : > { %1770 = vmatmul.mubr.msk.f32.gmra.mxu0 %vm341_vm1, %v293_v7 }
  0xd4   : > { %525 = vmatprep.mubr.f32.mxu0 %v3244_v0 }
  0xd6   : > { %v294_v8 = vpop.trf.xlu0 }
  0xd7   : > { %1771 = vmatmul.mubr.msk.f32.gmra.mxu0 %vm341_vm1, %v294_v8 }
  0xd8   : > { %531 = vmatprep.mubr.f32.mxu0 %v3244_v0 }
  0xda   : > { %v295_v9 = vpop.trf.xlu0 }
  0xdb   : > { %1772 = vmatmul.mubr.msk.f32.gmra.mxu0 %vm341_vm1, %v295_v9 }
  0xdc   : > { %537 = vmatprep.mubr.f32.mxu0 %v3244_v0 }
  0xde   : > { %v296_v10 = vpop.trf.xlu0 }
  0xdf   : > { %1773 = vmatmul.mubr.msk.f32.gmra.mxu0 %vm341_vm1, %v296_v10 }
  0xe0   : > { %543 = vmatprep.mubr.f32.mxu0 %v3244_v0 }
  0xe2   : > { %v297_v11 = vpop.trf.xlu0 }
  0xe3   : > { %1774 = vmatmul.mubr.msk.f32.gmra.mxu0 %vm341_vm1, %v297_v11 }
  0xe4   : > { %549 = vmatprep.mubr.f32.mxu0 %v3244_v0 }
  0xe6   : > { %v298_v12 = vpop.trf.xlu0 }
  0xe7   : > { %1775 = vmatmul.mubr.msk.f32.gmra.mxu0 %vm341_vm1, %v298_v12 }
  0xe8   : > { %555 = vmatprep.mubr.f32.mxu0 %v3244_v0 }
  0xea   : > { %v299_v13 = vpop.trf.xlu0 }
  0xeb   : > { %1776 = vmatmul.mubr.msk.f32.gmra.mxu0 %vm341_vm1, %v299_v13 }
  0xec   : > { %561 = vmatprep.mubr.f32.mxu0 %v3244_v0 }
  0xee   : > { %v300_v14 = vpop.trf.xlu0 }
  0xef   : > { %1777 = vmatmul.mubr.msk.f32.gmra.mxu0 %vm341_vm1, %v300_v14 }
  0xf0   : > { %567 = vmatprep.mubr.f32.mxu0 %v3244_v0 }
  0xf2   : > { %v301_v15 = vpop.trf.xlu0 }
  0xf3   : > { %1778 = vmatmul.mubr.msk.f32.gmra.mxu0 %vm341_vm1, %v301_v15 }
  0xf4   : > { %573 = vmatprep.mubr.f32.mxu0 %v3244_v0 }
  0xf6   : > { %v302_v16 = vpop.trf.xlu0 }
  0xf7   : > { %1779 = vmatmul.mubr.msk.f32.gmra.mxu0 %vm341_vm1, %v302_v16 }
  0xf8   : > { %579 = vmatprep.mubr.f32.mxu0 %v3244_v0 }
  0xfa   : > { %v303_v17 = vpop.trf.xlu0 }
  0xfb   : > { %1780 = vmatmul.mubr.msk.f32.gmra.mxu0 %vm341_vm1, %v303_v17 }
  0xfc   : > { %585 = vmatprep.mubr.f32.mxu0 %v3244_v0 }
  0xfe   : > { %v304_v18 = vpop.trf.xlu0 }
  0xff   : > { %1781 = vmatmul.mubr.msk.f32.gmra.mxu0 %vm341_vm1, %v304_v18 }
 0x100   : > { %591 = vmatprep.mubr.f32.mxu0 %v3244_v0 }
 0x102   : > { %v305_v19 = vpop.trf.xlu0 }
 0x103   : > { %1782 = vmatmul.mubr.msk.f32.gmra.mxu0 %vm341_vm1, %v305_v19 }
 0x104   : > { %597 = vmatprep.mubr.f32.mxu0 %v3244_v0 }
 0x106   : > { %v306_v20 = vpop.trf.xlu0 }
 0x107   : > { %1783 = vmatmul.mubr.msk.f32.gmra.mxu0 %vm341_vm1, %v306_v20 }
 0x10a   : > { %v323_v21 = vpop.trf.xlu0 }
 0x10b   : > { %1784 = vmatmul.mubr.msk.f32.vlgmr.msra.gmra.mxu1 %vm341_vm1, %v323_v21 }
 0x10c   : > { %609 = vmatprep.mubr.f32.mxu1 %v3244_v0 }
 0x10e   : > { %v324_v22 = vpop.trf.xlu0 }
 0x10f   : > { %1785 = vmatmul.mubr.msk.f32.gmra.mxu1 %vm341_vm1, %v324_v22 }
 0x110   : > { %615 = vmatprep.mubr.f32.mxu1 %v3244_v0 }
 0x112   : > { %v325_v23 = vpop.trf.xlu0 }
 0x113   : > { %1786 = vmatmul.mubr.msk.f32.gmra.mxu1 %vm341_vm1, %v325_v23 }
 0x114   : > { %621 = vmatprep.mubr.f32.mxu1 %v3244_v0 }
 0x116   : > { %v326_v24 = vpop.trf.xlu0 }
 0x117   : > { %1787 = vmatmul.mubr.msk.f32.gmra.mxu1 %vm341_vm1, %v326_v24 }
 0x118   : > { %627 = vmatprep.mubr.f32.mxu1 %v3244_v0 }
 0x11a   : > { %v327_v25 = vpop.trf.xlu0 }
 0x11b   : > { %1788 = vmatmul.mubr.msk.f32.gmra.mxu1 %vm341_vm1, %v327_v25 }
 0x11c   : > { %633 = vmatprep.mubr.f32.mxu1 %v3244_v0 }
 0x11e   : > { %v328_v26 = vpop.trf.xlu0 }
 0x11f   : > { %1789 = vmatmul.mubr.msk.f32.gmra.mxu1 %vm341_vm1, %v328_v26 }
 0x120   : > { %639 = vmatprep.mubr.f32.mxu1 %v3244_v0 }
 0x122   : > { %v329_v27 = vpop.trf.xlu0 }
 0x123   : > { %1790 = vmatmul.mubr.msk.f32.gmra.mxu1 %vm341_vm1, %v329_v27 }
 0x124   : > { %645 = vmatprep.mubr.f32.mxu1 %v3244_v0 }
 0x126   : > { %v330_v28 = vpop.trf.xlu0 }
 0x127   : > { %1791 = vmatmul.mubr.msk.f32.gmra.mxu1 %vm341_vm1, %v330_v28 }
 0x128   : > { %651 = vmatprep.mubr.f32.mxu1 %v3244_v0 }
 0x12a   : > { %v331_v29 = vpop.trf.xlu0 }
 0x12b   : > { %1792 = vmatmul.mubr.msk.f32.gmra.mxu1 %vm341_vm1, %v331_v29 }
 0x12c   : > { %657 = vmatprep.mubr.f32.mxu1 %v3244_v0 }
 0x12e   : > { %v332_v30 = vpop.trf.xlu0 }
 0x12f   : > { %1793 = vmatmul.mubr.msk.f32.gmra.mxu1 %vm341_vm1, %v332_v30 }
 0x130   : > { %663 = vmatprep.mubr.f32.mxu1 %v3244_v0 }
 0x132   : > { %v333_v31 = vpop.trf.xlu0 }
 0x133   : > { %1794 = vmatmul.mubr.msk.f32.gmra.mxu1 %vm341_vm1, %v333_v31 }
 0x134   : > { %669 = vmatprep.mubr.f32.mxu1 %v3244_v0 }
 0x136   : > { %v334_v32 = vpop.trf.xlu0 }
 0x137   : > { %1795 = vmatmul.mubr.msk.f32.gmra.mxu1 %vm341_vm1, %v334_v32 }
 0x138   : > { %675 = vmatprep.mubr.f32.mxu1 %v3244_v0 }
 0x13a   : > { %v335_v33 = vpop.trf.xlu0 }
 0x13b   : > { %1796 = vmatmul.mubr.msk.f32.gmra.mxu1 %vm341_vm1, %v335_v33 }
 0x13c   : > { %681 = vmatprep.mubr.f32.mxu1 %v3244_v0 }
 0x13e   : > { %v336_v34 = vpop.trf.xlu0 }
 0x13f   : > { %1797 = vmatmul.mubr.msk.f32.gmra.mxu1 %vm341_vm1, %v336_v34 }
 0x140   : > { %687 = vmatprep.mubr.f32.mxu1 %v3244_v0 }
 0x142   : > { %v337_v35 = vpop.trf.xlu0 }
 0x143   : > { %1798 = vmatmul.mubr.msk.f32.gmra.mxu1 %vm341_vm1, %v337_v35 }
 0x144   : > { %693 = vmatprep.mubr.f32.mxu1 %v3244_v0 }
 0x146   : > { %v338_v36 = vpop.trf.xlu0 }
 0x147   : > { %1799 = vmatmul.mubr.msk.f32.gmra.mxu1 %vm341_vm1, %v338_v36 }
 0x18b   : > { %v2493_v37 = vpop.f32.mrf.mxu0 }
 0x18c   : > { %v3284_v39 = vsub.f32 1.0, %v2493_v37 }
 0x18d   : > { %v2495_v38 = vpop.f32.mrf.mxu0 }
 0x18e   : > { %v3283_v40 = vsub.f32 1.0, %v2495_v38 }
 0x18f   : > { %v2503_v42 = vpop.f32.mrf.mxu0 }
 0x190   : > { %v764_v41 = vmin.f32 %v3284_v39, %v3283_v40  ;;  %v3282_v62 = vsub.f32 1.0, %v2503_v42 }
 0x191   : > { %v2505_v43 = vpop.f32.mrf.mxu0 }
 0x192   : > { %765 = vmin.xlane.f32.xlu1 %v764_v41  ;;  %v3279_v57 = vsub.f32 1.0, %v2505_v43 }
 0x193   : > { %v2507_v44 = vpop.f32.mrf.mxu0 }
 0x194   : > { %v767_v3 = vmin.f32 %v3282_v62, %v3279_v57  ;;  %v3278_v7 = vsub.f32 1.0, %v2507_v44 }
 0x195   : > { %v2509_v45 = vpop.f32.mrf.mxu0 }
 0x196   : > { %v3275_v2 = vsub.f32 1.0, %v2509_v45 }
 0x197   : > { %v2511_v46 = vpop.f32.mrf.mxu0 }
 0x198   : > { %v770_v10 = vmin.f32 %v3278_v7, %v3275_v2  ;;  %v3274_v17 = vsub.f32 1.0, %v2511_v46 }
 0x199   : > { %v2513_v47 = vpop.f32.mrf.mxu0 }
 0x19a   : > { %v3271_v13 = vsub.f32 1.0, %v2513_v47 }
 0x19b   : > { %v2515_v48 = vpop.f32.mrf.mxu0 }
 0x19c   : > { %v773_v20 = vmin.f32 %v3274_v17, %v3271_v13  ;;  %v3270_v27 = vsub.f32 1.0, %v2515_v48 }
 0x19d   : > { %v2517_v49 = vpop.f32.mrf.mxu0 }
 0x19e   : > { %v3267_v23 = vsub.f32 1.0, %v2517_v49 }
 0x19f   : > { %v2519_v50 = vpop.f32.mrf.mxu0 }
 0x1a0   : > { %v776_v30 = vmin.f32 %v3270_v27, %v3267_v23  ;;  %v3266_v41 = vsub.f32 1.0, %v2519_v50 }
 0x1a1   : > { %v2523_v52 = vpop.f32.mrf.mxu0 }
 0x1a2   : > { %v3263_v33 = vsub.f32 1.0, %v2523_v52 }
 0x1a3   : > { %v2537_v60 = vpop.f32.mrf.mxu0 }
 0x1a4   : > { %v3259_v0 = vsub.f32 1.0, %v2537_v60 }
 0x1a5   : > { %v2554_v5 = vpop.f32.mrf.mxu0 }
 0x1a7   : > { %v2565_v11 = vpop.f32.mrf.mxu0 }
 0x1a9   : > { %v2574_v15 = vpop.f32.mrf.mxu0 }
 0x1ab   : > { %v2585_v21 = vpop.f32.mrf.mxu0 }
 0x1ad   : > { %v2594_v25 = vpop.f32.mrf.mxu0 }
 0x1af   : > { %v2605_v31 = vpop.f32.mrf.mxu0 }
 0x1b1   : > { %v2614_v35 = vpop.f32.mrf.mxu0 }
 0x1cb   : > { %v2521_v51 = vpop.f32.mrf.mxu1 }
 0x1cc   : > { %v3260_v54 = vsub.f32 1.0, %v2521_v51 }
 0x1cd   : > { %v2525_v53 = vpop.f32.mrf.mxu1 }
 0x1ce   : > { %v3255_v55 = vsub.f32 1.0, %v2525_v53 }
 0x1cf   : > { %v2529_v56 = vpop.f32.mrf.mxu1 }
 0x1d0   : > { %v3254_v58 = vsub.f32 1.0, %v2529_v56  ;;  %v812_v59 = vmin.f32 %v3260_v54, %v3255_v55  ;;  %v3269_v54 = vsub.f32 1.0, %v2585_v21 }
 0x1d1   : > { %v2539_v61 = vpop.f32.mrf.mxu1 }
 0x1d2   : > { %v3253_v63 = vsub.f32 1.0, %v2539_v61  ;;  %813 = vmin.xlane.f32.xlu1 %v812_v59 }
 0x1d3   : > { %v2543_v1 = vpop.f32.mrf.mxu1 }
 0x1d4   : > { %v815_v4 = vmin.f32 %v3254_v58, %v3253_v63  ;;  %v3252_v8 = vsub.f32 1.0, %v2543_v1 }
 0x1d5   : > { %v2556_v6 = vpop.f32.mrf.mxu1 }
 0x1d6   : > { %768 = vmin.xlane.f32.xlu1 %v767_v3  ;;  %816 = vmin.xlane.f32.xlu0 %v815_v4  ;;  %v3251_v9 = vsub.f32 1.0, %v2556_v6  ;;  %v779_v4 = vmin.f32 %v3266_v41, %v3263_v33 }
 0x1d7   : > { %v2567_v12 = vpop.f32.mrf.mxu1 }
 0x1d8   : > { %v818_v14 = vmin.f32 %v3252_v8, %v3251_v9  ;;  %v3248_v18 = vsub.f32 1.0, %v2567_v12  ;;  %v3262_v8 = vsub.f32 1.0, %v2565_v11 }
 0x1d9   : > { %v2576_v16 = vpop.f32.mrf.mxu1 }
 0x1da   : > { %771 = vmin.xlane.f32.xlu1 %v770_v10  ;;  %v3247_v19 = vsub.f32 1.0, %v2576_v16  ;;  %v2625_v10 = vpop.f32.mrf.mxu0 }
 0x1db   : > { %v2587_v22 = vpop.f32.mrf.mxu1 }
 0x1dc   : > { %v821_v24 = vmin.f32 %v3248_v18, %v3247_v19  ;;  %v3246_v28 = vsub.f32 1.0, %v2587_v22 }
 0x1dd   : > { %v2596_v26 = vpop.f32.mrf.mxu1 }
 0x1de   : > { %819 = vmin.xlane.f32.xlu1 %v818_v14  ;;  %v3245_v29 = vsub.f32 1.0, %v2596_v26 }
 0x1df   : > { %v2607_v32 = vpop.f32.mrf.mxu1 }
 0x1e0   : > { %v824_v34 = vmin.f32 %v3246_v28, %v3245_v29  ;;  %v3250_v59 = vsub.f32 1.0, %v2607_v32 }
 0x1e1   : > { %v2616_v36 = vpop.f32.mrf.mxu1 }
 0x1e2   : > { %774 = vmin.xlane.f32.xlu1 %v773_v20  ;;  %v3249_v3 = vsub.f32 1.0, %v2616_v36  ;;  %v3256_v20 = vsub.f32 1.0, %v2554_v5 }
 0x1e3   : > { %v2627_v14 = vpop.f32.mrf.mxu1 }
 0x1e4   : > { %3349 = vst [vmem:[#allocation11_spill] sm:$0xff] %v2627_v14  ;;  %v3258_v29 = vsub.f32 1.0, %v2627_v14 }
 0x1e6   : > { %822 = vmin.xlane.f32.xlu1 %v821_v24  ;;  %v827_v24 = vmin.f32 %v3250_v59, %v3249_v3  ;;  %v3261_v3 = vsub.f32 1.0, %v2574_v15 }
 0x1ea   : > { %777 = vmin.xlane.f32.xlu1 %v776_v30  ;;  %v2634_v30 = vpop.f32.mrf.mxu0 }
 0x1ec   : > { %v2645_v19 = vpop.f32.mrf.mxu0 }
 0x1ee   : > { %825 = vmin.xlane.f32.xlu1 %v824_v34  ;;  %v2636_v34 = vpop.f32.mrf.mxu1  ;;  %v2654_v59 = vpop.f32.mrf.mxu0 }
 0x1ef   : > { %3350 = vst [vmem:[#allocation12_spill] sm:$0xff] %v2636_v34  ;;  %v3257_v28 = vsub.f32 1.0, %v2636_v34 }
 0x1f0   : > { %v2647_v18 = vpop.f32.mrf.mxu1  ;;  %v2665_v55 = vpop.f32.mrf.mxu0 }
 0x1f1   : > { %3351 = vst [vmem:[#allocation13_spill] sm:$0xff] %v2647_v18  ;;  %v3265_v63 = vsub.f32 1.0, %v2647_v18 }
 0x1f2   : > { %780 = vmin.xlane.f32.xlu1 %v779_v4  ;;  %v782_v4 = vmin.f32 %v3259_v0, %v3256_v20  ;;  %v2656_v9 = vpop.f32.mrf.mxu1 }
 0x1f3   : > { %3352 = vst [vmem:[#allocation14_spill] sm:$0xff] %v2656_v9  ;;  %v3264_v58 = vsub.f32 1.0, %v2656_v9 }
 0x1f4   : > { %v2667_v20 = vpop.f32.mrf.mxu1 }
 0x1f5   : > { %3353 = vst [vmem:[#allocation15_spill] sm:$0xff] %v2667_v20 }
 0x1f6   : > { %828 = vmin.xlane.f32.xlu1 %v827_v24  ;;  %v830_v24 = vmin.f32 %v3258_v29, %v3257_v28  ;;  %v3268_v28 = vsub.f32 1.0, %v2594_v25  ;;  %v2674_v29 = vpop.f32.mrf.mxu0  ;;  %v2676_v0 = vpop.f32.mrf.mxu1 }
 0x1f7   : > { %3354 = vst [vmem:[#allocation16_spill] sm:$0xff] %v2676_v0 }
 0x1f8   : > { %v2686_v33 = vpop.f32.mrf.mxu1 }
 0x1f9   : > { %3355 = vst [vmem:[#allocation17_spill] sm:$0xff] %v2686_v33  ;;  %v3312_v34 = vsub.f32 1.0, %v2686_v33 }
 0x1fa   : > { %783 = vmin.xlane.f32.xlu1 %v782_v4  ;;  %v785_v4 = vmin.f32 %v3262_v8, %v3261_v3  ;;  %v3272_v3 = vsub.f32 1.0, %v2614_v35  ;;  %v2684_v8 = vpop.f32.mrf.mxu0  ;;  %v2696_v23 = vpop.f32.mrf.mxu1 }
 0x1fb   : > { %3356 = vst [vmem:[#allocation18_spill] sm:$0xff] %v2696_v23 }
 0x1fc   : > { %v2694_v41 = vpop.f32.mrf.mxu0  ;;  %v2706_v13 = vpop.f32.mrf.mxu1 }
 0x1fe   : > { %831 = vmin.xlane.f32.xlu1 %v830_v24  ;;  %v833_v24 = vmin.f32 %v3265_v63, %v3264_v58  ;;  %v3273_v58 = vsub.f32 1.0, %v2605_v31  ;;  %v3276_v63 = vsub.f32 1.0, %v2634_v30  ;;  %v2704_v27 = vpop.f32.mrf.mxu0  ;;  %v2716_v2 = vpop.f32.mrf.mxu1 }
 0x200   : > { %v2714_v17 = vpop.f32.mrf.mxu0  ;;  %v2726_v57 = vpop.f32.mrf.mxu1 }
 0x201   : > { %v3292_v62 = vsub.f32 1.0, %v2714_v17 }
 0x202   : > { %786 = vmin.xlane.f32.xlu1 %v785_v4  ;;  %v788_v4 = vmin.f32 %v3269_v54, %v3268_v28  ;;  %v3277_v28 = vsub.f32 1.0, %v2625_v10  ;;  %v3280_v54 = vsub.f32 1.0, %v2654_v59  ;;  %v2724_v7 = vpop.f32.mrf.mxu0  ;;  %v2736_v9 = vpop.f32.mrf.mxu1 }
 0x203   : > { %3357 = vst [vmem:[#allocation19_spill] sm:$0xff] %v2724_v7  ;;  %3359 = vst [vmem:[#allocation21_spill] sm:$0xff] %v2736_v9  ;;  %v3298_v18 = vsub.f32 1.0, %v2724_v7  ;;  %v3306_v7 = vsub.f32 1.0, %v2736_v9 }
 0x204   : > { %v2734_v39 = vpop.f32.mrf.mxu0 }
 0x205   : > { %3358 = vst [vmem:[#allocation20_spill] sm:$0xff] %v2734_v39 }
 0x206   : > { %834 = vmin.xlane.f32.xlu1 %v833_v24  ;;  %v791_v24 = vmin.f32 %v3273_v58, %v3272_v3  ;;  %v3281_v3 = vsub.f32 1.0, %v2645_v19  ;;  %v3286_v58 = vsub.f32 1.0, %v2674_v29 }
 0x20a   : > { %789 = vmin.xlane.f32.xlu1 %v788_v4  ;;  %v794_v4 = vmin.f32 %v3277_v28, %v3276_v63  ;;  %v3287_v63 = vsub.f32 1.0, %v2665_v55  ;;  %v3289_v28 = vsub.f32 1.0, %v2694_v41 }
 0x20e   : > { %792 = vmin.xlane.f32.xlu1 %v791_v24  ;;  %v797_v24 = vmin.f32 %v3281_v3, %v3280_v54  ;;  %v3290_v54 = vsub.f32 1.0, %v2684_v8 }
 0x212   : > { %795 = vmin.xlane.f32.xlu1 %v794_v4  ;;  %v800_v4 = vmin.f32 %v3287_v63, %v3286_v58  ;;  %v3293_v58 = vsub.f32 1.0, %v2704_v27  ;;  %v3297_v63 = vsub.f32 1.0, %v2734_v39 }
 0x216   : > { %798 = vmin.xlane.f32.xlu1 %v797_v24  ;;  %v803_v24 = vmin.f32 %v3290_v54, %v3289_v28  ;;  %v3301_v28 = vsub.f32 1.0, %v2667_v20  ;;  %v3300_v54 = vsub.f32 1.0, %v2676_v0  ;;  %v3362_v0 = vsub.f32 1.0, %v2493_v37 }
 0x21a   : > { %801 = vmin.xlane.f32.xlu1 %v800_v4  ;;  %v2744_v4 = vpop.f32.mrf.mxu1 }
 0x21b   : > { %v766_v3 = vpop.xlane.xlu1 %765  ;;  %v3311_v37 = vsub.f32 1.0, %v2744_v4 }
 0x21c   : > { %v860_v40 = vadd.f32 1e-05, %v766_v3  ;;  %v806_v3 = vmin.f32 %v3293_v58, %v3292_v62  ;;  %v3305_v62 = vsub.f32 1.0, %v2696_v23  ;;  %v3364_v23 = vsub.f32 1.0, %v2706_v13 }
 0x21e   : > { %1882 = vrcp.f32 %v860_v40  ;;  %804 = vmin.xlane.f32.xlu1 %v803_v24  ;;  %v809_v40 = vmin.f32 %v3298_v18, %v3297_v63  ;;  %v2753_v24 = vpop.f32.mrf.mxu1  ;;  %v3313_v63 = vsub.f32 1.0, %v2716_v2 }
 0x220   : > { %v2761_v58 = vpop.f32.mrf.mxu1  ;;  %v842_v20 = vmin.f32 %v3364_v23, %v3313_v63 }
 0x221   : > { %3360 = vst [vmem:[#allocation22_spill] sm:$0xff] %v2761_v58  ;;  %v3310_v23 = vsub.f32 1.0, %v2761_v58 }
 0x222   : > { %807 = vmin.xlane.f32.xlu1 %v806_v3  ;;  %v836_v3 = vmin.f32 %v3301_v28, %v3300_v54  ;;  %v2769_v18 = vpop.f32.mrf.mxu1  ;;  %v3363_v28 = vsub.f32 1.0, %v2495_v38 }
 0x223   : > { %3361 = vst [vmem:[#allocation23_spill] sm:$0xff] %v2769_v18 }
 0x224   : > { %v2781_v33 = vpop.f32.mrf.mxu1 }
 0x225   : > { %3365 = vst [vmem:[#allocation24_spill] sm:$0xff] %v2781_v33 }
 0x226   : > { %810 = vmin.xlane.f32.xlu1 %v809_v40  ;;  %v839_v40 = vmin.f32 %v3312_v34, %v3305_v62 }
 0x22a   : > { %837 = vmin.xlane.f32.xlu1 %v836_v3 }
 0x22b   : > { %v1883_v14 = vpop.eup %1882 }
 0x22c   : > { %v893_v39 = vmul.f32 -1.0, %v1883_v14  ;;  %v3307_v14 = vsub.f32 1.0, %v2726_v57 }
 0x22e   : > { %840 = vmin.xlane.f32.xlu1 %v839_v40  ;;  %v956_v54 = vmul.f32 %v893_v39, %v3362_v0  ;;  %v957_v3 = vmul.f32 %v893_v39, %v3363_v28  ;;  %v3308_v0 = vsub.f32 1.0, %v2753_v24  ;;  %v845_v38 = vmin.f32 %v3307_v14, %v3306_v7  ;;  %v2789_v39 = vpop.f32.mrf.mxu1 }
 0x22f   : > { %3366 = vst [vmem:[#allocation25_spill] sm:$0xff] %v2789_v39  ;;  %v3309_v28 = vsub.f32 1.0, %v2769_v18  ;;  %v3314_v7 = vsub.f32 1.0, %v2789_v39 }
 0x230   : > { %v1020_v62 = vmul.f32 1.442695, %v956_v54  ;;  %v1022_v40 = vmul.f32 1.442695, %v957_v3  ;;  %v848_v54 = vmin.f32 %v3311_v37, %v3308_v0  ;;  %v3315_v3 = vsub.f32 1.0, %v2781_v33 }
 0x232   : > { %843 = vmin.xlane.f32.xlu1 %v842_v20  ;;  %1884 = vpow2.f32 %v1020_v62  ;;  %v2797_v20 = vpop.f32.mrf.mxu1  ;;  %v851_v62 = vmin.f32 %v3310_v23, %v3309_v28 }
 0x233   : > { %1886 = vpow2.f32 %v1022_v40  ;;  %3367 = vst [vmem:[#allocation26_spill] sm:$0xff] %v2797_v20 }
 0x234   : > { %v2805_v40 = vpop.f32.mrf.mxu1 }
 0x235   : > { %3368 = vst [vmem:[#allocation27_spill] sm:$0xff] %v2805_v40  ;;  %v3319_v14 = vsub.f32 1.0, %v2805_v40 }
 0x236   : > { %846 = vmin.xlane.f32.xlu1 %v845_v38  ;;  %v3320_v38 = vsub.f32 1.0, %v2797_v20 }
 0x238   : > { %v857_v28 = vmin.f32 %v3320_v38, %v3319_v14 }
 0x23a   : > { %849 = vmin.xlane.f32.xlu1 %v848_v54  ;;  %v854_v54 = vmin.f32 %v3315_v3, %v3314_v7 }
 0x23e   : > { %852 = vmin.xlane.f32.xlu1 %v851_v62 }
 0x23f   : > { %v2813_v0 = vpop.eup %1884 }
 0x240   : > { %3369 = vst [vmem:[#allocation28_spill] sm:$0xff] %v2813_v0  ;;  %v2819_v23 = vpop.eup %1886 }
 0x241   : > { %3370 = vst [vmem:[#allocation29_spill] sm:$0xff] %v2819_v23  ;;  %v1148_v62 = vadd.f32 %v2819_v23, %v2813_v0  ;;  %v3372_v23 = vsub.f32 1.0, %v2505_v43 }
 0x242   : > { %855 = vmin.xlane.f32.xlu1 %v854_v54 }
 0x246   : > { %858 = vmin.xlane.f32.xlu1 %v857_v28  ;;  %v3371_v28 = vsub.f32 1.0, %v2503_v42 }
 0x24a   : > { %1149 = vadd.xlane.f32.xlu1 %v1148_v62 }
 0x25b   : > { %v814_v37 = vpop.xlane.xlu1 %813 }
 0x25f   : > { %v769_v34 = vpop.xlane.xlu1 %768 }
 0x260   : > { %v861_v63 = vadd.f32 1e-05, %v769_v34 }
 0x262   : > { %1888 = vrcp.f32 %v861_v63 }
 0x263   : > { %v772_v7 = vpop.xlane.xlu1 %771 }
 0x264   : > { %v862_v54 = vadd.f32 1e-05, %v772_v7  ;;  %v3373_v7 = vsub.f32 1.0, %v2507_v44  ;;  %v3375_v44 = vsub.f32 1.0, %v2511_v46 }
 0x266   : > { %1890 = vrcp.f32 %v862_v54 }
 0x267   : > { %v820_v3 = vpop.xlane.xlu1 %819 }
 0x26b   : > { %v775_v39 = vpop.xlane.xlu1 %774 }
 0x26c   : > { %v863_v40 = vadd.f32 1e-05, %v775_v39  ;;  %v3374_v39 = vsub.f32 1.0, %v2509_v45  ;;  %v3376_v45 = vsub.f32 1.0, %v2513_v47 }
 0x26e   : > { %1892 = vrcp.f32 %v863_v40 }
 0x26f   : > { %v1889_v20 = vpop.eup %1888  ;;  %v823_v14 = vpop.xlane.xlu1 %822 }
 0x270   : > { %v895_v38 = vmul.f32 -1.0, %v1889_v20 }
 0x272   : > { %v958_v33 = vmul.f32 %v895_v38, %v3371_v28  ;;  %v959_v62 = vmul.f32 %v895_v38, %v3372_v23 }
 0x273   : > { %v1891_v0 = vpop.eup %1890  ;;  %v778_v18 = vpop.xlane.xlu1 %777 }
 0x274   : > { %v1024_v34 = vmul.f32 1.442695, %v958_v33  ;;  %v1026_v63 = vmul.f32 1.442695, %v959_v62  ;;  %v897_v58 = vmul.f32 -1.0, %v1891_v0  ;;  %v817_v62 = vpop.xlane.xlu0 %816 }
 0x275   : > { %v864_v9 = vadd.f32 1e-05, %v778_v18  ;;  %v876_v0 = vadd.f32 1e-05, %v814_v37  ;;  %v877_v18 = vadd.f32 1e-05, %v817_v62 }
 0x276   : > { %1894 = vpow2.f32 %v1024_v34  ;;  %v960_v54 = vmul.f32 %v897_v58, %v3373_v7  ;;  %v961_v40 = vmul.f32 %v897_v58, %v3374_v39 }
 0x277   : > { %1896 = vpow2.f32 %v1026_v63  ;;  %v2831_v20 = vpop.xlane.xlu1 %825 }
 0x278   : > { %v1028_v42 = vmul.f32 1.442695, %v960_v54  ;;  %v1030_v28 = vmul.f32 1.442695, %v961_v40 }
 0x27a   : > { %1898 = vpow2.f32 %v1028_v42  ;;  %v878_v42 = vadd.f32 1e-05, %v820_v3 }
 0x27b   : > { %v1893_v43 = vpop.eup %1892  ;;  %1900 = vpow2.f32 %v1030_v28  ;;  %v781_v23 = vpop.xlane.xlu1 %780 }
 0x27c   : > { %v899_v33 = vmul.f32 -1.0, %v1893_v43  ;;  %1902 = vrcp.f32 %v864_v9  ;;  %v865_v38 = vadd.f32 1e-05, %v781_v23 }
 0x27e   : > { %v962_v34 = vmul.f32 %v899_v33, %v3375_v44  ;;  %v963_v58 = vmul.f32 %v899_v33, %v3376_v45  ;;  %1904 = vrcp.f32 %v865_v38  ;;  %v879_v38 = vadd.f32 1e-05, %v823_v14 }
 0x27f   : > { %v2837_v63 = vpop.xlane.xlu1 %828  ;;  %1906 = vrcp.f32 %v876_v0  ;;  %v3377_v44 = vsub.f32 1.0, %v2515_v48  ;;  %v3378_v45 = vsub.f32 1.0, %v2517_v49  ;;  %v3380_v48 = vsub.f32 1.0, %v2519_v50 }
 0x280   : > { %v1032_v7 = vmul.f32 1.442695, %v962_v34  ;;  %v1034_v54 = vmul.f32 1.442695, %v963_v58  ;;  %v3381_v49 = vsub.f32 1.0, %v2523_v52  ;;  %v3382_v50 = vsub.f32 1.0, %v2521_v51 }
 0x281   : > { %v3383_v52 = vsub.f32 1.0, %v2537_v60 }
 0x282   : > { %1908 = vpow2.f32 %v1032_v7 }
 0x283   : > { %v2839_v39 = vpop.eup %1894  ;;  %1910 = vpow2.f32 %v1034_v54  ;;  %v784_v9 = vpop.xlane.xlu1 %783 }
 0x284   : > { %v2841_v37 = vpop.eup %1896  ;;  %v866_v40 = vadd.f32 1e-05, %v784_v9  ;;  %1912 = vrcp.f32 %v877_v18 }
 0x285   : > { %v1151_v46 = vadd.f32 %v2841_v37, %v2839_v39 }
 0x286   : > { %1914 = vrcp.f32 %v866_v40 }
 0x287   : > { %v2845_v47 = vpop.eup %1898  ;;  %1152 = vadd.xlane.f32.xlu1 %v1151_v46  ;;  %v2847_v28 = vpop.xlane.xlu1 %831  ;;  %1916 = vrcp.f32 %v878_v42 }
 0x288   : > { %v2849_v43 = vpop.eup %1900 }
 0x289   : > { %v1903_v23 = vpop.eup %1902  ;;  %v1154_v33 = vadd.f32 %v2849_v43, %v2845_v47 }
 0x28a   : > { %v901_v0 = vmul.f32 -1.0, %v1903_v23 }
 0x28b   : > { %1155 = vadd.xlane.f32.xlu1 %v1154_v33  ;;  %v787_v62 = vpop.xlane.xlu1 %786  ;;  %v1905_v7 = vpop.eup %1904 }
 0x28c   : > { %v964_v34 = vmul.f32 %v901_v0, %v3377_v44  ;;  %v965_v3 = vmul.f32 %v901_v0, %v3378_v45  ;;  %v867_v58 = vadd.f32 1e-05, %v787_v62  ;;  %v1907_v54 = vpop.eup %1906  ;;  %v903_v40 = vmul.f32 -1.0, %v1905_v7 }
 0x28d   : > { %v925_v44 = vmul.f32 -1.0, %v1907_v54  ;;  %v3385_v54 = vsub.f32 1.0, %v2525_v53 }
 0x28e   : > { %v1036_v18 = vmul.f32 1.442695, %v964_v34  ;;  %v1038_v9 = vmul.f32 1.442695, %v965_v3  ;;  %1918 = vrcp.f32 %v867_v58  ;;  %v966_v23 = vmul.f32 %v903_v40, %v3380_v48 }
 0x28f   : > { %v2857_v46 = vpop.eup %1908  ;;  %1920 = vrcp.f32 %v879_v38  ;;  %v2859_v42 = vpop.xlane.xlu1 %834  ;;  %v967_v33 = vmul.f32 %v903_v40, %v3381_v49  ;;  %v3384_v40 = vsub.f32 1.0, %v2554_v5 }
 0x290   : > { %v2861_v14 = vpop.eup %1910  ;;  %1922 = vpow2.f32 %v1036_v18  ;;  %v1040_v34 = vmul.f32 1.442695, %v966_v23  ;;  %v988_v18 = vmul.f32 %v925_v44, %v3382_v50  ;;  %v989_v23 = vmul.f32 %v925_v44, %v3385_v54 }
 0x291   : > { %3379 = vst [vmem:[#allocation30_spill] sm:$0xff] %v2861_v14  ;;  %1924 = vpow2.f32 %v1038_v9  ;;  %v1157_v0 = vadd.f32 %v2861_v14, %v2857_v46  ;;  %v1913_v62 = vpop.eup %1912  ;;  %v1042_v45 = vmul.f32 1.442695, %v967_v33  ;;  %v3387_v44 = vsub.f32 1.0, %v2539_v61 }
 0x292   : > { %1926 = vpow2.f32 %v1040_v34  ;;  %v927_v7 = vmul.f32 -1.0, %v1913_v62  ;;  %v3386_v62 = vsub.f32 1.0, %v2529_v56  ;;  %v1084_v51 = vmul.f32 1.442695, %v988_v18 }
 0x293   : > { %v1915_v38 = vpop.eup %1914  ;;  %1158 = vadd.xlane.f32.xlu1 %v1157_v0  ;;  %v790_v3 = vpop.xlane.xlu1 %789  ;;  %1928 = vpow2.f32 %v1042_v45  ;;  %v1086_v60 = vmul.f32 1.442695, %v989_v23  ;;  %v3388_v18 = vsub.f32 1.0, %v2565_v11 }
 0x294   : > { %v905_v58 = vmul.f32 -1.0, %v1915_v38  ;;  %v1917_v33 = vpop.eup %1916  ;;  %v868_v34 = vadd.f32 1e-05, %v790_v3  ;;  %v990_v45 = vmul.f32 %v927_v7, %v3386_v62 }
 0x296   : > { %v968_v9 = vmul.f32 %v905_v58, %v3383_v52  ;;  %v969_v48 = vmul.f32 %v905_v58, %v3384_v40  ;;  %v929_v52 = vmul.f32 -1.0, %v1917_v33  ;;  %v1088_v3 = vmul.f32 1.442695, %v990_v45 }
 0x297   : > { %v793_v49 = vpop.xlane.xlu1 %792 }
 0x298   : > { %v1044_v0 = vmul.f32 1.442695, %v968_v9  ;;  %v1046_v14 = vmul.f32 1.442695, %v969_v48  ;;  %v869_v38 = vadd.f32 1e-05, %v793_v49  ;;  %v991_v9 = vmul.f32 %v927_v7, %v3387_v44 }
 0x299   : > { %v3390_v49 = vsub.f32 1.0, %v2543_v1 }
 0x29a   : > { %1930 = vpow2.f32 %v1044_v0  ;;  %v1090_v11 = vmul.f32 1.442695, %v991_v9 }
 0x29b   : > { %v1919_v50 = vpop.eup %1918  ;;  %1932 = vpow2.f32 %v1046_v14  ;;  %v796_v5 = vpop.xlane.xlu1 %795  ;;  %v3389_v14 = vsub.f32 1.0, %v2574_v15  ;;  %v992_v33 = vmul.f32 %v929_v52, %v3390_v49  ;;  %v3391_v15 = vsub.f32 1.0, %v2556_v6 }
 0x29c   : > { %v1921_v58 = vpop.eup %1920  ;;  %v907_v40 = vmul.f32 -1.0, %v1919_v50  ;;  %1934 = vrcp.f32 %v868_v34  ;;  %v870_v56 = vadd.f32 1e-05, %v796_v5  ;;  %v880_v50 = vadd.f32 1e-05, %v2831_v20 }
 0x29d   : > { %v2879_v53 = vpop.eup %1922  ;;  %1936 = vrcp.f32 %v869_v38  ;;  %v2891_v0 = vmul.f32 -1.0, %v1921_v58  ;;  %v1092_v58 = vmul.f32 1.442695, %v992_v33  ;;  %v881_v20 = vadd.f32 1e-05, %v2837_v63 }
 0x29e   : > { %v2883_v48 = vpop.eup %1924  ;;  %1938 = vpow2.f32 %v1084_v51  ;;  %v970_v54 = vmul.f32 %v907_v40, %v3388_v18  ;;  %v971_v23 = vmul.f32 %v907_v40, %v3389_v14  ;;  %v993_v51 = vmul.f32 %v929_v52, %v3391_v15 }
 0x29f   : > { %1940 = vpow2.f32 %v1086_v60  ;;  %v1160_v61 = vadd.f32 %v2883_v48, %v2879_v53  ;;  %v799_v7 = vpop.xlane.xlu1 %798  ;;  %v2895_v38 = vpop.eup %1926  ;;  %v3392_v40 = vsub.f32 1.0, %v2567_v12  ;;  %v882_v14 = vadd.f32 1e-05, %v2847_v28 }
 0x2a0   : > { %v1048_v34 = vmul.f32 1.442695, %v970_v54  ;;  %v1050_v62 = vmul.f32 1.442695, %v971_v23  ;;  %1942 = vrcp.f32 %v870_v56  ;;  %v871_v45 = vadd.f32 1e-05, %v799_v7  ;;  %v2899_v1 = vpop.eup %1928 }
 0x2a1   : > { %1944 = vpow2.f32 %v1088_v3  ;;  %1161 = vadd.xlane.f32.xlu1 %v1160_v61  ;;  %v1163_v60 = vadd.f32 %v2899_v1, %v2895_v38  ;;  %v994_v44 = vmul.f32 %v2891_v0, %v3392_v40  ;;  %v1094_v6 = vmul.f32 1.442695, %v993_v51 }
 0x2a2   : > { %1946 = vpow2.f32 %v1048_v34  ;;  %v883_v63 = vadd.f32 1e-05, %v2859_v42  ;;  %v3396_v42 = vsub.f32 1.0, %v2614_v35  ;;  %v3398_v35 = vsub.f32 1.0, %v2634_v30 }
 0x2a3   : > { %1948 = vpow2.f32 %v1050_v62  ;;  %v802_v5 = vpop.xlane.xlu1 %801  ;;  %v1096_v18 = vmul.f32 1.442695, %v994_v44  ;;  %v3400_v30 = vsub.f32 1.0, %v2645_v19 }
 0x2a4   : > { %1950 = vrcp.f32 %v871_v45  ;;  %v872_v9 = vadd.f32 1e-05, %v802_v5  ;;  %v3393_v45 = vsub.f32 1.0, %v2585_v21 }
 0x2a5   : > { %1952 = vpow2.f32 %v1090_v11  ;;  %1164 = vadd.xlane.f32.xlu1 %v1163_v60  ;;  %v3394_v11 = vsub.f32 1.0, %v2594_v25  ;;  %v3395_v60 = vsub.f32 1.0, %v2605_v31  ;;  %v3397_v31 = vsub.f32 1.0, %v2625_v10 }
 0x2a6   : > { %1954 = vrcp.f32 %v872_v9 }
 0x2a7   : > { %v2907_v52 = vpop.eup %1930  ;;  %1956 = vrcp.f32 %v880_v50  ;;  %v805_v3 = vpop.xlane.xlu1 %804 }
 0x2a8   : > { %v2910_v56 = vpop.eup %1932  ;;  %1958 = vpow2.f32 %v1092_v58  ;;  %v873_v54 = vadd.f32 1e-05, %v805_v3 }
 0x2a9   : > { %v1935_v12 = vpop.eup %1934  ;;  %1960 = vpow2.f32 %v1094_v6  ;;  %v1166_v23 = vadd.f32 %v2910_v56, %v2907_v52 }
 0x2aa   : > { %v1937_v49 = vpop.eup %1936  ;;  %v909_v33 = vmul.f32 -1.0, %v1935_v12  ;;  %1962 = vrcp.f32 %v873_v54 }
 0x2ab   : > { %v2915_v61 = vpop.eup %1938  ;;  %1964 = vrcp.f32 %v881_v20  ;;  %v911_v7 = vmul.f32 -1.0, %v1937_v49  ;;  %1167 = vadd.xlane.f32.xlu1 %v1166_v23  ;;  %v808_v34 = vpop.xlane.xlu1 %807 }
 0x2ac   : > { %v2918_v62 = vpop.eup %1940  ;;  %1966 = vpow2.f32 %v1096_v18  ;;  %v972_v28 = vmul.f32 %v909_v33, %v3393_v45  ;;  %v973_v15 = vmul.f32 %v909_v33, %v3394_v11  ;;  %v874_v51 = vadd.f32 1e-05, %v808_v34 }
 0x2ad   : > { %v1943_v50 = vpop.eup %1942  ;;  %1968 = vrcp.f32 %v882_v14  ;;  %v974_v5 = vmul.f32 %v911_v7, %v3395_v60  ;;  %v975_v58 = vmul.f32 %v911_v7, %v3396_v42 }
 0x2ae   : > { %v2928_v40 = vpop.eup %1944  ;;  %v1052_v44 = vmul.f32 1.442695, %v972_v28  ;;  %v1054_v9 = vmul.f32 1.442695, %v973_v15  ;;  %v913_v6 = vmul.f32 -1.0, %v1943_v50  ;;  %1970 = vrcp.f32 %v874_v51 }
 0x2af   : > { %v2930_v21 = vpop.eup %1946  ;;  %1972 = vrcp.f32 %v883_v63  ;;  %v1056_v25 = vmul.f32 1.442695, %v974_v5  ;;  %v1058_v20 = vmul.f32 1.442695, %v975_v58  ;;  %v811_v3 = vpop.xlane.xlu1 %810  ;;  %v3401_v15 = vsub.f32 1.0, %v2654_v59 }
 0x2b0   : > { %v2932_v18 = vpop.eup %1948  ;;  %1974 = vpow2.f32 %v1052_v44  ;;  %v976_v54 = vmul.f32 %v913_v6, %v3397_v31  ;;  %v977_v12 = vmul.f32 %v913_v6, %v3398_v35  ;;  %v875_v45 = vadd.f32 1e-05, %v811_v3 }
 0x2b1   : > { %v1951_v14 = vpop.eup %1950  ;;  %1976 = vpow2.f32 %v1054_v9  ;;  %v1169_v23 = vadd.f32 %v2932_v18, %v2930_v21  ;;  %v3402_v44 = vsub.f32 1.0, %v2665_v55  ;;  %v3403_v6 = vsub.f32 1.0, %v2674_v29 }
 0x2b2   : > { %v2940_v49 = vpop.eup %1952  ;;  %1978 = vpow2.f32 %v1056_v25  ;;  %v1060_v33 = vmul.f32 1.442695, %v976_v54  ;;  %v1062_v63 = vmul.f32 1.442695, %v977_v12  ;;  %v915_v7 = vmul.f32 -1.0, %v1951_v14 }
 0x2b3   : > { %3399 = vst [vmem:[#allocation31_spill] sm:$0xff] %v2940_v49  ;;  %v1955_v34 = vpop.eup %1954  ;;  %1980 = vpow2.f32 %v1058_v20  ;;  %1170 = vadd.xlane.f32.xlu1 %v1169_v23  ;;  %v838_v10 = vpop.xlane.xlu1 %837  ;;  %v3404_v14 = vsub.f32 1.0, %v2576_v16 }
 0x2b4   : > { %v1957_v28 = vpop.eup %1956  ;;  %1982 = vpow2.f32 %v1060_v33  ;;  %v978_v11 = vmul.f32 %v915_v7, %v3400_v30  ;;  %v979_v51 = vmul.f32 %v915_v7, %v3401_v15  ;;  %v917_v50 = vmul.f32 -1.0, %v1955_v34 }
 0x2b5   : > { %v2946_v60 = vpop.eup %1958  ;;  %1984 = vpow2.f32 %v1062_v63  ;;  %v884_v19 = vadd.f32 1e-05, %v838_v10  ;;  %v995_v23 = vmul.f32 %v2891_v0, %v3404_v14  ;;  %v933_v55 = vmul.f32 -1.0, %v1957_v28 }
 0x2b6   : > { %v2948_v5 = vpop.eup %1960  ;;  %v1064_v42 = vmul.f32 1.442695, %v978_v11  ;;  %v1066_v58 = vmul.f32 1.442695, %v979_v51  ;;  %v980_v9 = vmul.f32 %v917_v50, %v3402_v44  ;;  %v981_v25 = vmul.f32 %v917_v50, %v3403_v6 }
 0x2b7   : > { %v1963_v20 = vpop.eup %1962  ;;  %1986 = vrcp.f32 %v875_v45  ;;  %v841_v3 = vpop.xlane.xlu1 %840  ;;  %v3405_v63 = vsub.f32 1.0, %v2684_v8  ;;  %v3406_v34 = vsub.f32 1.0, %v2694_v41  ;;  %v1098_v28 = vmul.f32 1.442695, %v995_v23 }
 0x2b8   : > { %v1965_v59 = vpop.eup %1964  ;;  %1988 = vpow2.f32 %v1064_v42  ;;  %v1068_v31 = vmul.f32 1.442695, %v980_v9  ;;  %v1070_v54 = vmul.f32 1.442695, %v981_v25  ;;  %v919_v35 = vmul.f32 -1.0, %v1963_v20 }
 0x2b9   : > { %v2954_v12 = vpop.eup %1966  ;;  %1990 = vpow2.f32 %v1066_v58  ;;  %v885_v33 = vadd.f32 1e-05, %v841_v3  ;;  %v3407_v50 = vsub.f32 1.0, %v2587_v22  ;;  %v3408_v41 = vsub.f32 1.0, %v2704_v27 }
 0x2ba   : > { %v1969_v29 = vpop.eup %1968  ;;  %1992 = vpow2.f32 %v1068_v31  ;;  %v982_v7 = vmul.f32 %v919_v35, %v3405_v63  ;;  %v983_v45 = vmul.f32 %v919_v35, %v3406_v34  ;;  %v3409_v9 = vsub.f32 1.0, %v2714_v17 }
 0x2bb   : > { %v1971_v10 = vpop.eup %1970  ;;  %1994 = vpow2.f32 %v1070_v54  ;;  %v844_v30 = vpop.xlane.xlu1 %843  ;;  %v996_v42 = vmul.f32 %v933_v55, %v3407_v50  ;;  %v3410_v20 = vsub.f32 1.0, %v2596_v26  ;;  %v935_v3 = vmul.f32 -1.0, %v1965_v59 }
 0x2bc   : > { %v1973_v11 = vpop.eup %1972  ;;  %v1072_v15 = vmul.f32 1.442695, %v982_v7  ;;  %v1074_v51 = vmul.f32 1.442695, %v983_v45  ;;  %v921_v16 = vmul.f32 -1.0, %v1971_v10  ;;  %1996 = vrcp.f32 %v884_v19 }
 0x2bd   : > { %v2963_v0 = vpop.eup %1974  ;;  %1998 = vrcp.f32 %v885_v33  ;;  %v886_v8 = vadd.f32 1e-05, %v844_v30  ;;  %v997_v19 = vmul.f32 %v933_v55, %v3410_v20  ;;  %v1100_v17 = vmul.f32 1.442695, %v996_v42  ;;  %v3413_v42 = vld [vmem:[#allocation19_spill] sm:$0xff] }
 0x2be   : > { %v2967_v58 = vpop.eup %1976  ;;  %2000 = vpow2.f32 %v1072_v15  ;;  %v984_v44 = vmul.f32 %v921_v16, %v3408_v41  ;;  %v985_v6 = vmul.f32 %v921_v16, %v3409_v9  ;;  %v3411_v7 = vsub.f32 1.0, %v2607_v32 }
 0x2bf   : > { %v2973_v25 = vpop.eup %1978  ;;  %2002 = vpow2.f32 %v1074_v51  ;;  %v1172_v22 = vadd.f32 %v2967_v58, %v2963_v0  ;;  %v847_v31 = vpop.xlane.xlu1 %846  ;;  %v1102_v55 = vmul.f32 1.442695, %v997_v19  ;;  %v937_v45 = vmul.f32 -1.0, %v1969_v29 }
 0x2c0   : > { %v2979_v54 = vpop.eup %1980  ;;  %v1076_v35 = vmul.f32 1.442695, %v984_v44  ;;  %v1078_v14 = vmul.f32 1.442695, %v985_v6  ;;  %2004 = vrcp.f32 %v886_v8  ;;  %v887_v27 = vadd.f32 1e-05, %v847_v31 }
 0x2c1   : > { %v2981_v23 = vpop.eup %1982  ;;  %2006 = vpow2.f32 %v1098_v28  ;;  %1173 = vadd.xlane.f32.xlu1 %v1172_v22  ;;  %v1175_v26 = vadd.f32 %v2979_v54, %v2973_v25  ;;  %v998_v34 = vmul.f32 %v935_v3, %v3411_v7  ;;  %v939_v28 = vmul.f32 -1.0, %v1973_v11  ;;  %v3415_v44 = vld [vmem:[#allocation20_spill] sm:$0xff]  ;;  %v3417_v31 = vld [vmem:[#allocation11_spill] sm:$0xff] }
 0x2c2   : > { %v2985_v59 = vpop.eup %1984  ;;  %2008 = vpow2.f32 %v1076_v35  ;;  %v3412_v32 = vsub.f32 1.0, %v2616_v36  ;;  %v3414_v8 = vsub.f32 1.0, %v3413_v42  ;;  %v3416_v9 = vsub.f32 1.0, %v3415_v44 }
 0x2c3   : > { %2010 = vpow2.f32 %v1078_v14  ;;  %v850_v33 = vpop.xlane.xlu1 %849  ;;  %v1178_v51 = vadd.f32 %v2985_v59, %v2981_v23  ;;  %v1104_v22 = vmul.f32 1.442695, %v998_v34  ;;  %v3418_v35 = vsub.f32 1.0, %v3417_v31  ;;  %v3419_v14 = vld [vmem:[#allocation12_spill] sm:$0xff] }
 0x2c4   : > { %v1987_v63 = vpop.eup %1986  ;;  %2012 = vrcp.f32 %v887_v27  ;;  %v888_v10 = vadd.f32 1e-05, %v850_v33  ;;  %v999_v29 = vmul.f32 %v935_v3, %v3412_v32  ;;  %v3420_v27 = vsub.f32 1.0, %v3419_v14 }
 0x2c5   : > { %v2989_v30 = vpop.eup %1988  ;;  %2014 = vpow2.f32 %v1100_v17  ;;  %v923_v15 = vmul.f32 -1.0, %v1987_v63  ;;  %1176 = vadd.xlane.f32.xlu1 %v1175_v26  ;;  %v1000_v11 = vmul.f32 %v937_v45, %v3418_v35 }
 0x2c6   : > { %v2993_v16 = vpop.eup %1990  ;;  %2016 = vrcp.f32 %v888_v10  ;;  %v1001_v17 = vmul.f32 %v937_v45, %v3420_v27  ;;  %v3421_v10 = vld [vmem:[#allocation13_spill] sm:$0xff]  ;;  %v1106_v45 = vmul.f32 1.442695, %v999_v29 }
 0x2c7   : > { %v2995_v50 = vpop.eup %1992  ;;  %2018 = vpow2.f32 %v1102_v55  ;;  %v986_v41 = vmul.f32 %v923_v15, %v3414_v8  ;;  %v987_v6 = vmul.f32 %v923_v15, %v3416_v9  ;;  %v853_v20 = vpop.xlane.xlu1 %852  ;;  %v1181_v33 = vadd.f32 %v2993_v16, %v2989_v30  ;;  %v3423_v8 = vld [vmem:[#allocation14_spill] sm:$0xff] }
 0x2c8   : > { %v3003_v19 = vpop.eup %1994  ;;  %v889_v26 = vadd.f32 1e-05, %v853_v20  ;;  %v3422_v34 = vsub.f32 1.0, %v3421_v10  ;;  %v3424_v44 = vsub.f32 1.0, %v3423_v8  ;;  %v3425_v20 = vld [vmem:[#allocation15_spill] sm:$0xff] }
 0x2c9   : > { %v1997_v55 = vpop.eup %1996  ;;  %v1080_v36 = vmul.f32 1.442695, %v986_v41  ;;  %v1082_v3 = vmul.f32 1.442695, %v987_v6  ;;  %1179 = vadd.xlane.f32.xlu1 %v1178_v51  ;;  %v1184_v63 = vadd.f32 %v3003_v19, %v2995_v50  ;;  %v1108_v6 = vmul.f32 1.442695, %v1000_v11 }
 0x2ca   : > { %v1999_v7 = vpop.eup %1998  ;;  %v1002_v15 = vmul.f32 %v939_v28, %v3422_v34  ;;  %v941_v32 = vmul.f32 -1.0, %v1997_v55  ;;  %2020 = vrcp.f32 %v889_v26  ;;  %v1003_v41 = vmul.f32 %v939_v28, %v3424_v44  ;;  %v3427_v55 = vld [vmem:[#allocation16_spill] sm:$0xff] }
 0x2cb   : > { %v3015_v42 = vpop.eup %2000  ;;  %2022 = vpow2.f32 %v1080_v36  ;;  %1185 = vadd.xlane.f32.xlu0 %v1184_v63  ;;  %v856_v51 = vpop.xlane.xlu1 %855  ;;  %v3426_v31 = vsub.f32 1.0, %v3425_v20  ;;  %v1110_v26 = vmul.f32 1.442695, %v1001_v17  ;;  %v3428_v10 = vsub.f32 1.0, %v3427_v55 }
 0x2cc   : > { %v3019_v9 = vpop.eup %2002  ;;  %2024 = vpow2.f32 %v1082_v3  ;;  %v890_v14 = vadd.f32 1e-05, %v856_v51  ;;  %v1112_v63 = vmul.f32 1.442695, %v1002_v15  ;;  %v943_v34 = vmul.f32 -1.0, %v1999_v7 }
 0x2cd   : > { %v1004_v35 = vmul.f32 %v941_v32, %v3426_v31  ;;  %v2005_v27 = vpop.eup %2004  ;;  %2026 = vpow2.f32 %v1104_v22  ;;  %v1005_v29 = vmul.f32 %v941_v32, %v3428_v10  ;;  %1182 = vadd.xlane.f32.xlu1 %v1181_v33  ;;  %v1187_v28 = vadd.f32 %v3019_v9, %v3015_v42 }
 0x2ce   : > { %v3027_v36 = vpop.eup %2006  ;;  %v945_v11 = vmul.f32 -1.0, %v2005_v27  ;;  %2028 = vrcp.f32 %v890_v14  ;;  %v1114_v8 = vmul.f32 1.442695, %v1003_v41  ;;  %v3429_v17 = vsub.f32 1.0, %v2706_v13  ;;  %v3431_v41 = vld [vmem:[#allocation17_spill] sm:$0xff] }
 0x2cf   : > { %v3029_v3 = vpop.eup %2008  ;;  %2030 = vpow2.f32 %v1106_v45  ;;  %v1116_v22 = vmul.f32 1.442695, %v1004_v35  ;;  %v859_v32 = vpop.xlane.xlu1 %858  ;;  %v1118_v20 = vmul.f32 1.442695, %v1005_v29  ;;  %v3430_v15 = vsub.f32 1.0, %v2716_v2 }
 0x2d0   : > { %v3031_v44 = vpop.eup %2010  ;;  %2032 = vpow2.f32 %v1108_v6  ;;  %v1008_v33 = vmul.f32 %v945_v11, %v3429_v17  ;;  %v3432_v6 = vsub.f32 1.0, %v3431_v41  ;;  %v891_v13 = vadd.f32 1e-05, %v859_v32 }
 0x2d1   : > { %v2013_v51 = vpop.eup %2012  ;;  %2034 = vpow2.f32 %v1110_v26  ;;  %v1009_v7 = vmul.f32 %v945_v11, %v3430_v15  ;;  %1188 = vadd.xlane.f32.xlu1 %v1187_v28  ;;  %v1190_v31 = vadd.f32 %v3031_v44, %v3029_v3  ;;  %v1196_v29 = vadd.f32 %v2918_v62, %v2915_v61  ;;  %v3433_v28 = vld [vmem:[#allocation18_spill] sm:$0xff] }
 0x2d2   : > { %v3039_v45 = vpop.eup %2014  ;;  %2036 = vpow2.f32 %v1112_v63  ;;  %v1006_v35 = vmul.f32 %v943_v34, %v3432_v6  ;;  %v1124_v26 = vmul.f32 1.442695, %v1008_v33  ;;  %v947_v2 = vmul.f32 -1.0, %v2013_v51 }
 0x2d3   : > { %v2017_v14 = vpop.eup %2016  ;;  %2038 = vpow2.f32 %v1114_v8  ;;  %1191 = vadd.xlane.f32.xlu0 %v1190_v31  ;;  %v1126_v10 = vmul.f32 1.442695, %v1009_v7  ;;  %v3434_v63 = vsub.f32 1.0, %v3433_v28  ;;  %v3435_v15 = vsub.f32 1.0, %v2744_v4  ;;  %v3438_v4 = vld [vmem:[#allocation21_spill] sm:$0xff] }
 0x2d4   : > { %v3043_v27 = vpop.eup %2018  ;;  %2040 = vpow2.f32 %v1116_v22  ;;  %v949_v55 = vmul.f32 -1.0, %v2017_v14  ;;  %v1120_v17 = vmul.f32 1.442695, %v1006_v35  ;;  %v3436_v32 = vsub.f32 1.0, %v2753_v24 }
 0x2d5   : > { %2042 = vpow2.f32 %v1118_v20  ;;  %v1007_v11 = vmul.f32 %v943_v34, %v3434_v63  ;;  %v3437_v33 = vsub.f32 1.0, %v2726_v57  ;;  %v1202_v34 = vadd.f32 %v2948_v5, %v2946_v60 }
 0x2d6   : > { %v1012_v8 = vmul.f32 %v949_v55, %v3435_v15  ;;  %v1013_v31 = vmul.f32 %v949_v55, %v3436_v32  ;;  %2044 = vrcp.f32 %v891_v13  ;;  %v3439_v6 = vsub.f32 1.0, %v3438_v4  ;;  %v1150_v13 = vpop.xlane.xlu1 %1149 }
 0x2d7   : > { %v2021_v41 = vpop.eup %2020  ;;  %1197 = vadd.xlane.f32.xlu0 %v1196_v29  ;;  %2046 = vpow2.f32 %v1124_v26  ;;  %v1010_v51 = vmul.f32 %v947_v2, %v3437_v33  ;;  %v1122_v26 = vmul.f32 1.442695, %v1007_v11  ;;  %v3441_v11 = vld [vmem:[#allocation22_spill] sm:$0xff]  ;;  %v3443_v33 = vld [vmem:[#allocation23_spill] sm:$0xff] }
 0x2d8   : > { %v3053_v22 = vpop.eup %2022  ;;  %v1132_v20 = vmul.f32 1.442695, %v1012_v8  ;;  %2048 = vpow2.f32 %v1126_v10  ;;  %v1011_v24 = vmul.f32 %v947_v2, %v3439_v6  ;;  %v1134_v35 = vmul.f32 1.442695, %v1013_v31 }
 0x2d9   : > { %v3059_v7 = vpop.eup %2024  ;;  %v951_v14 = vmul.f32 -1.0, %v2021_v41  ;;  %2050 = vpow2.f32 %v1120_v17  ;;  %v1128_v63 = vmul.f32 1.442695, %v1010_v51  ;;  %v1199_v2 = vadd.f32 %v2940_v49, %v2928_v40 }
 0x2da   : > { %v3063_v55 = vpop.eup %2026  ;;  %v1193_v57 = vadd.f32 %v3059_v7, %v3053_v22  ;;  %2052 = vpow2.f32 %v1132_v20  ;;  %v1130_v8 = vmul.f32 1.442695, %v1011_v24  ;;  %v3442_v17 = vsub.f32 1.0, %v3441_v11 }
 0x2db   : > { %v2029_v29 = vpop.eup %2028  ;;  %1203 = vadd.xlane.f32.xlu0 %v1202_v34  ;;  %2054 = vrcp.f32 %v1150_v13  ;;  %v1208_v31 = vadd.f32 %v3043_v27, %v3039_v45  ;;  %v3444_v51 = vsub.f32 1.0, %v3443_v33  ;;  %v3445_v34 = vld [vmem:[#allocation24_spill] sm:$0xff]  ;;  %v3447_v13 = vld [vmem:[#allocation25_spill] sm:$0xff] }
 0x2dc   : > { %v3067_v28 = vpop.eup %2030  ;;  %v953_v10 = vmul.f32 -1.0, %v2029_v29  ;;  %1194 = vadd.xlane.f32.xlu1 %v1193_v57  ;;  %2056 = vpow2.f32 %v1134_v35  ;;  %v1014_v32 = vmul.f32 %v951_v14, %v3442_v17  ;;  %v3446_v4 = vsub.f32 1.0, %v3445_v34 }
 0x2dd   : > { %3440 = vst [vmem:[#allocation19_spill] sm:$0xff] %v3067_v28  ;;  %v3071_v15 = vpop.eup %2032  ;;  %2058 = vpow2.f32 %v1122_v26  ;;  %v1015_v20 = vmul.f32 %v951_v14, %v3444_v51  ;;  %v3448_v57 = vsub.f32 1.0, %v3447_v13 }
 0x2de   : > { %v3077_v41 = vpop.eup %2034  ;;  %v1016_v6 = vmul.f32 %v953_v10, %v3446_v4  ;;  %2060 = vpow2.f32 %v1128_v63  ;;  %v1136_v26 = vmul.f32 1.442695, %v1014_v32  ;;  %v3452_v4 = vld [vmem:[#allocation26_spill] sm:$0xff] }
 0x2df   : > { %v1017_v29 = vmul.f32 %v953_v10, %v3448_v57  ;;  %v3085_v24 = vpop.eup %2036  ;;  %1209 = vadd.xlane.f32.xlu0 %v1208_v31  ;;  %2062 = vpow2.f32 %v1130_v8  ;;  %v1214_v14 = vadd.f32 %v3077_v41, %v3071_v15  ;;  %v1138_v51 = vmul.f32 1.442695, %v1015_v20  ;;  %v3454_v57 = vld [vmem:[#allocation27_spill] sm:$0xff] }
 0x2e0   : > { %3449 = vst [vmem:[#allocation20_spill] sm:$0xff] %v3085_v24  ;;  %v3087_v35 = vpop.eup %2038  ;;  %v1140_v11 = vmul.f32 1.442695, %v1016_v6  ;;  %1200 = vadd.xlane.f32.xlu1 %v1199_v2  ;;  %v1205_v10 = vadd.f32 %v3027_v36, %v2954_v12  ;;  %v1211_v20 = vadd.f32 %v3067_v28, %v3063_v55  ;;  %v3453_v6 = vsub.f32 1.0, %v3452_v4 }
 0x2e1   : > { %3450 = vst [vmem:[#allocation11_spill] sm:$0xff] %v3087_v35  ;;  %v1142_v17 = vmul.f32 1.442695, %v1017_v29  ;;  %v3089_v49 = vpop.eup %2040  ;;  %v3455_v29 = vsub.f32 1.0, %v3454_v57  ;;  %v1217_v4 = vadd.f32 %v3087_v35, %v3085_v24  ;;  %v3461_v57 = vld [vmem:[#allocation29_spill] sm:$0xff]  ;;  %v1372_v35 = vld [vmem:[#allocation7] sm:$0xff] }
 0x2e2   : > { %v3093_v33 = vpop.eup %2042  ;;  %2064 = vpow2.f32 %v1140_v11  ;;  %v1373_v24 = vld [vmem:[#allocation7 + $0x8] sm:$0xff] }
 0x2e3   : > { %2066 = vpow2.f32 %v1142_v17  ;;  %1215 = vadd.xlane.f32.xlu0 %v1214_v14  ;;  %v2045_v63 = vpop.eup %2044  ;;  %v1220_v8 = vadd.f32 %v3093_v33, %v3089_v49 }
 0x2e4   : > { %1206 = vadd.xlane.f32.xlu1 %v1205_v10  ;;  %v3097_v31 = vpop.eup %2046  ;;  %2068 = vpow2.f32 %v1136_v26  ;;  %v955_v2 = vmul.f32 -1.0, %v2045_v63 }
 0x2e5   : > { %v3101_v32 = vpop.eup %2048  ;;  %2070 = vpow2.f32 %v1138_v51 }
 0x2e6   : > { %v3105_v34 = vpop.eup %2050  ;;  %v1018_v13 = vmul.f32 %v955_v2, %v3453_v6  ;;  %v1019_v11 = vmul.f32 %v955_v2, %v3455_v29  ;;  %v1226_v51 = vadd.f32 %v3101_v32, %v3097_v31 }
 0x2e7   : > { %3451 = vst [vmem:[#allocation12_spill] sm:$0xff] %v3105_v34  ;;  %1221 = vadd.xlane.f32.xlu0 %v1220_v8  ;;  %v3111_v17 = vpop.eup %2052 }
 0x2e8   : > { %3456 = vst [vmem:[#allocation13_spill] sm:$0xff] %v3111_v17  ;;  %1212 = vadd.xlane.f32.xlu1 %v1211_v20  ;;  %v2055_v26 = vpop.eup %2054  ;;  %v1144_v14 = vmul.f32 1.442695, %v1018_v13  ;;  %v1146_v10 = vmul.f32 1.442695, %v1019_v11  ;;  %v3460_v20 = vld [vmem:[#allocation28_spill] sm:$0xff] }
 0x2e9   : > { %v3115_v63 = vpop.eup %2056  ;;  %v1245_v28 = vmul.f32 0.5, %v2055_v26 }
 0x2ea   : > { %3457 = vst [vmem:[#allocation14_spill] sm:$0xff] %v3115_v63  ;;  %v3119_v6 = vpop.eup %2058  ;;  %2072 = vpow2.f32 %v1144_v14  ;;  %v1232_v8 = vadd.f32 %v3115_v63, %v3111_v17 }
 0x2eb   : > { %3458 = vst [vmem:[#allocation15_spill] sm:$0xff] %v3119_v6  ;;  %1227 = vadd.xlane.f32.xlu0 %v1226_v51  ;;  %2074 = vpow2.f32 %v1146_v10  ;;  %v3121_v2 = vpop.eup %2060  ;;  %v1308_v13 = vmul.f32 %v3460_v20, %v1245_v28  ;;  %v1309_v29 = vmul.f32 %v3461_v57, %v1245_v28  ;;  %v1223_v26 = vadd.f32 %v3119_v6, %v3105_v34 }
 0x2ec   : > { %1218 = vadd.xlane.f32.xlu1 %v1217_v4  ;;  %3459 = vst [vmem:[#allocation16_spill] sm:$0xff] %v3121_v2  ;;  %v3127_v11 = vpop.eup %2062 }
 0x2ed   : > { %3462 = vst [vmem:[#allocation17_spill] sm:$0xff] %v3127_v11  ;;  %v1436_v4 = vadd.f32 %v1372_v35, %v1308_v13  ;;  %v1437_v20 = vadd.f32 %v1373_v24, %v1309_v29  ;;  %v1229_v28 = vadd.f32 %v3127_v11, %v3121_v2 }
 0x2ef   : > { %v3131_v14 = vpop.eup %2064  ;;  %1233 = vadd.xlane.f32.xlu0 %v1232_v8  ;;  %v1500_v6 = vmax.f32 %v1436_v4, %v1437_v20  ;;  %v1374_v20 = vld [vmem:[#allocation7 + $0x10] sm:$0xff] }
 0x2f0   : > { %3463 = vst [vmem:[#allocation18_spill] sm:$0xff] %v3131_v14  ;;  %v3133_v10 = vpop.eup %2066  ;;  %1224 = vadd.xlane.f32.xlu1 %v1223_v26 }
 0x2f1   : > { %3464 = vst [vmem:[#allocation21_spill] sm:$0xff] %v3133_v10  ;;  %v1238_v51 = vadd.f32 %v3133_v10, %v3131_v14  ;;  %v3137_v63 = vpop.eup %2068 }
 0x2f2   : > { %3465 = vst [vmem:[#allocation22_spill] sm:$0xff] %v3137_v63  ;;  %v3141_v57 = vpop.eup %2070 }
 0x2f3   : > { %3466 = vst [vmem:[#allocation23_spill] sm:$0xff] %v3141_v57  ;;  %1239 = vadd.xlane.f32.xlu0 %v1238_v51  ;;  %v1235_v8 = vadd.f32 %v3141_v57, %v3137_v63 }
 0x2f4   : > { %1230 = vadd.xlane.f32.xlu1 %v1229_v28  ;;  %v1375_v28 = vld [vmem:[#allocation7 + $0x18] sm:$0xff] }
 0x2f7   : > { %1501 = vmax.xlane.f32.xlu0 %v1500_v6  ;;  %v3145_v26 = vpop.eup %2072 }
 0x2f8   : > { %3467 = vst [vmem:[#allocation24_spill] sm:$0xff] %v3145_v26  ;;  %1236 = vadd.xlane.f32.xlu1 %v1235_v8  ;;  %v3147_v10 = vpop.eup %2074 }
 0x2f9   : > { %3468 = vst [vmem:[#allocation25_spill] sm:$0xff] %v3147_v10  ;;  %v1241_v24 = vadd.f32 %v3147_v10, %v3145_v26  ;;  %v1376_v10 = vld [vmem:[#allocation7 + $0x20] sm:$0xff] }
 0x2fc   : > { %1242 = vadd.xlane.f32.xlu1 %v1241_v24  ;;  %v1377_v24 = vld [vmem:[#allocation7 + $0x28] sm:$0xff] }
 0x310   : > { %v1153_v35 = vpop.xlane.xlu1 %1152 }
 0x311   : > { %2076 = vrcp.f32 %v1153_v35 }
 0x314   : > { %v1156_v13 = vpop.xlane.xlu1 %1155 }
 0x315   : > { %2078 = vrcp.f32 %v1156_v13 }
 0x31c   : > { %v1159_v29 = vpop.xlane.xlu1 %1158 }
 0x31d   : > { %2080 = vrcp.f32 %v1159_v29 }
 0x31e   : > { %v2077_v51 = vpop.eup %2076 }
 0x31f   : > { %v1247_v4 = vmul.f32 0.5, %v2077_v51 }
 0x321   : > { %v1310_v6 = vmul.f32 %v2839_v39, %v1247_v4  ;;  %v1311_v8 = vmul.f32 %v2841_v37, %v1247_v4  ;;  %v1378_v37 = vld [vmem:[#allocation7 + $0x30] sm:$0xff] }
 0x322   : > { %v2079_v57 = vpop.eup %2078 }
 0x323   : > { %v1249_v63 = vmul.f32 0.5, %v2079_v57  ;;  %v1438_v11 = vadd.f32 %v1374_v20, %v1310_v6  ;;  %v1439_v2 = vadd.f32 %v1375_v28, %v1311_v8  ;;  %v1379_v57 = vld [vmem:[#allocation7 + $0x38] sm:$0xff]  ;;  %v1380_v6 = vld [vmem:[#allocation7 + $0x40] sm:$0xff] }
 0x324   : > { %v3469_v20 = vld [vmem:[#allocation30_spill] sm:$0xff] }
 0x325   : > { %v1503_v26 = vmax.f32 %v1438_v11, %v1439_v2  ;;  %v1312_v35 = vmul.f32 %v2845_v47, %v1249_v63  ;;  %v1313_v13 = vmul.f32 %v2849_v43, %v1249_v63 }
 0x327   : > { %1504 = vmax.xlane.f32.xlu1 %v1503_v26  ;;  %v1440_v29 = vadd.f32 %v1376_v10, %v1312_v35  ;;  %v1441_v51 = vadd.f32 %v1377_v24, %v1313_v13 }
 0x329   : > { %v1506_v14 = vmax.f32 %v1440_v29, %v1441_v51  ;;  %v1382_v29 = vld [vmem:[#allocation7 + $0x50] sm:$0xff]  ;;  %v1383_v51 = vld [vmem:[#allocation7 + $0x58] sm:$0xff] }
 0x32a   : > { %v2081_v34 = vpop.eup %2080  ;;  %v1162_v17 = vpop.xlane.xlu1 %1161 }
 0x32b   : > { %v1251_v39 = vmul.f32 0.5, %v2081_v34  ;;  %2082 = vrcp.f32 %v1162_v17  ;;  %1507 = vmax.xlane.f32.xlu0 %v1506_v14  ;;  %v1381_v34 = vld [vmem:[#allocation7 + $0x48] sm:$0xff] }
 0x32d   : > { %v1314_v4 = vmul.f32 %v2857_v46, %v1251_v39  ;;  %v1315_v28 = vmul.f32 %v3469_v20, %v1251_v39 }
 0x32e   : > { %v1165_v2 = vpop.xlane.xlu1 %1164 }
 0x32f   : > { %2084 = vrcp.f32 %v1165_v2  ;;  %v1442_v47 = vadd.f32 %v1378_v37, %v1314_v4  ;;  %v1443_v11 = vadd.f32 %v1379_v57, %v1315_v28 }
 0x331   : > { %v1509_v43 = vmax.f32 %v1442_v47, %v1443_v11  ;;  %v1385_v47 = vld [vmem:[#allocation7 + $0x68] sm:$0xff] }
 0x333   : > { %1510 = vmax.xlane.f32.xlu1 %v1509_v43 }
 0x334   : > { %v1168_v63 = vpop.xlane.xlu1 %1167 }
 0x335   : > { %2086 = vrcp.f32 %v1168_v63 }
 0x338   : > { %v2083_v10 = vpop.eup %2082 }
 0x339   : > { %v1253_v26 = vmul.f32 0.5, %v2083_v10 }
 0x33b   : > { %v1316_v17 = vmul.f32 %v2879_v53, %v1253_v26  ;;  %v1317_v14 = vmul.f32 %v2883_v48, %v1253_v26  ;;  %v1384_v48 = vld [vmem:[#allocation7 + $0x60] sm:$0xff] }
 0x33c   : > { %v2085_v8 = vpop.eup %2084  ;;  %v1171_v46 = vpop.xlane.xlu1 %1170 }
 0x33d   : > { %v1255_v24 = vmul.f32 0.5, %v2085_v8  ;;  %v1444_v35 = vadd.f32 %v1380_v6, %v1316_v17  ;;  %v1445_v13 = vadd.f32 %v1381_v34, %v1317_v14  ;;  %2088 = vrcp.f32 %v1171_v46  ;;  %v1386_v34 = vld [vmem:[#allocation7 + $0x70] sm:$0xff]  ;;  %v1387_v17 = vld [vmem:[#allocation7 + $0x78] sm:$0xff] }
 0x33f   : > { %v1318_v39 = vmul.f32 %v2895_v38, %v1255_v24  ;;  %v1319_v37 = vmul.f32 %v2899_v1, %v1255_v24  ;;  %v1512_v57 = vmax.f32 %v1444_v35, %v1445_v13 }
 0x341   : > { %1513 = vmax.xlane.f32.xlu0 %v1512_v57  ;;  %v1446_v4 = vadd.f32 %v1382_v29, %v1318_v39  ;;  %v1447_v20 = vadd.f32 %v1383_v51, %v1319_v37  ;;  %v1388_v57 = vld [vmem:[#allocation7 + $0x80] sm:$0xff] }
 0x342   : > { %v2087_v28 = vpop.eup %2086 }
 0x343   : > { %v1257_v53 = vmul.f32 0.5, %v2087_v28  ;;  %v1515_v2 = vmax.f32 %v1446_v4, %v1447_v20  ;;  %v1389_v4 = vld [vmem:[#allocation7 + $0x88] sm:$0xff] }
 0x345   : > { %1516 = vmax.xlane.f32.xlu1 %v1515_v2  ;;  %v1320_v11 = vmul.f32 %v2907_v52, %v1257_v53  ;;  %v1321_v43 = vmul.f32 %v2910_v56, %v1257_v53 }
 0x347   : > { %v1448_v63 = vadd.f32 %v1384_v48, %v1320_v11  ;;  %v1449_v10 = vadd.f32 %v1385_v47, %v1321_v43  ;;  %v1390_v47 = vld [vmem:[#allocation7 + $0x90] sm:$0xff]  ;;  %v1391_v11 = vld [vmem:[#allocation7 + $0x98] sm:$0xff] }
 0x349   : > { %v1518_v26 = vmax.f32 %v1448_v63, %v1449_v10 }
 0x34a   : > { %v2089_v38 = vpop.eup %2088  ;;  %v1174_v6 = vpop.xlane.xlu1 %1173 }
 0x34b   : > { %v1259_v1 = vmul.f32 0.5, %v2089_v38  ;;  %2090 = vrcp.f32 %v1174_v6  ;;  %1519 = vmax.xlane.f32.xlu0 %v1518_v26 }
 0x34d   : > { %v1322_v14 = vmul.f32 %v2930_v21, %v1259_v1  ;;  %v1323_v8 = vmul.f32 %v2932_v18, %v1259_v1 }
 0x34e   : > { %v1177_v46 = vpop.xlane.xlu1 %1176 }
 0x34f   : > { %2092 = vrcp.f32 %v1177_v46  ;;  %v1450_v24 = vadd.f32 %v1386_v34, %v1322_v14  ;;  %v1451_v52 = vadd.f32 %v1387_v17, %v1323_v8  ;;  %v1392_v34 = vld [vmem:[#allocation7 + $0xa0] sm:$0xff] }
 0x351   : > { %v1521_v35 = vmax.f32 %v1450_v24, %v1451_v52  ;;  %v1393_v24 = vld [vmem:[#allocation7 + $0xa8] sm:$0xff] }
 0x352   : > { %v1180_v56 = vpop.xlane.xlu1 %1179 }
 0x353   : > { %2094 = vrcp.f32 %v1180_v56  ;;  %1522 = vmax.xlane.f32.xlu1 %v1521_v35 }
 0x354   : > { %v1186_v13 = vpop.xlane.xlu0 %1185 }
 0x355   : > { %2096 = vrcp.f32 %v1186_v13 }
 0x356   : > { %v1183_v29 = vpop.xlane.xlu1 %1182 }
 0x357   : > { %2098 = vrcp.f32 %v1183_v29 }
 0x358   : > { %v2091_v51 = vpop.eup %2090 }
 0x359   : > { %v1261_v39 = vmul.f32 0.5, %v2091_v51 }
 0x35a   : > { %v1189_v37 = vpop.xlane.xlu1 %1188 }
 0x35b   : > { %2100 = vrcp.f32 %v1189_v37  ;;  %v1324_v21 = vmul.f32 %v2963_v0, %v1261_v39  ;;  %v1325_v18 = vmul.f32 %v2967_v58, %v1261_v39  ;;  %v1397_v39 = vld [vmem:[#allocation7 + $0xc8] sm:$0xff] }
 0x35c   : > { %v2093_v20 = vpop.eup %2092  ;;  %v1192_v28 = vpop.xlane.xlu0 %1191 }
 0x35d   : > { %v1263_v53 = vmul.f32 0.5, %v2093_v20  ;;  %v1452_v2 = vadd.f32 %v1388_v57, %v1324_v21  ;;  %v1453_v48 = vadd.f32 %v1389_v4, %v1325_v18  ;;  %2102 = vrcp.f32 %v1192_v28  ;;  %v1394_v57 = vld [vmem:[#allocation7 + $0xb0] sm:$0xff]  ;;  %v1395_v4 = vld [vmem:[#allocation7 + $0xb8] sm:$0xff] }
 0x35f   : > { %v1326_v43 = vmul.f32 %v2973_v25, %v1263_v53  ;;  %v1327_v63 = vmul.f32 %v2979_v54, %v1263_v53  ;;  %v1524_v10 = vmax.f32 %v1452_v2, %v1453_v48  ;;  %v1396_v54 = vld [vmem:[#allocation7 + $0xc0] sm:$0xff] }
 0x360   : > { %v2095_v26 = vpop.eup %2094  ;;  %v1198_v38 = vpop.xlane.xlu0 %1197 }
 0x361   : > { %v1265_v6 = vmul.f32 0.5, %v2095_v26  ;;  %1525 = vmax.xlane.f32.xlu0 %v1524_v10  ;;  %v1454_v0 = vadd.f32 %v1390_v47, %v1326_v43  ;;  %v1455_v1 = vadd.f32 %v1391_v11, %v1327_v63  ;;  %2104 = vrcp.f32 %v1198_v38  ;;  %v1398_v43 = vld [vmem:[#allocation7 + $0xd0] sm:$0xff]  ;;  %v1399_v26 = vld [vmem:[#allocation7 + $0xd8] sm:$0xff] }
 0x362   : > { %v2097_v58 = vpop.eup %2096 }
 0x363   : > { %v1269_v17 = vmul.f32 0.5, %v2097_v58  ;;  %v1527_v14 = vmax.f32 %v1454_v0, %v1455_v1  ;;  %v1328_v8 = vmul.f32 %v2981_v23, %v1265_v6  ;;  %v1329_v46 = vmul.f32 %v2985_v59, %v1265_v6  ;;  %v1400_v6 = vld [vmem:[#allocation7 + $0xe0] sm:$0xff]  ;;  %v1401_v0 = vld [vmem:[#allocation7 + $0xe8] sm:$0xff] }
 0x364   : > { %v2099_v25 = vpop.eup %2098  ;;  %v1204_v52 = vpop.xlane.xlu0 %1203 }
 0x365   : > { %v1267_v35 = vmul.f32 0.5, %v2099_v25  ;;  %v1332_v56 = vmul.f32 %v2995_v50, %v1269_v17  ;;  %v1333_v13 = vmul.f32 %v3003_v19, %v1269_v17  ;;  %1528 = vmax.xlane.f32.xlu1 %v1527_v14  ;;  %v1195_v29 = vpop.xlane.xlu1 %1194  ;;  %v1456_v51 = vadd.f32 %v1392_v34, %v1328_v8 }
 0x366   : > { %2106 = vrcp.f32 %v1195_v29  ;;  %v1457_v37 = vadd.f32 %v1393_v24, %v1329_v46 }
 0x367   : > { %v1330_v23 = vmul.f32 %v2989_v30, %v1267_v35  ;;  %v1331_v59 = vmul.f32 %v2993_v16, %v1267_v35  ;;  %2108 = vrcp.f32 %v1204_v52  ;;  %v1460_v21 = vadd.f32 %v1396_v54, %v1332_v56  ;;  %v1404_v52 = vld [vmem:[#allocation7 + $0x100] sm:$0xff]  ;;  %v1405_v54 = vld [vmem:[#allocation7 + $0x108] sm:$0xff] }
 0x368   : > { %v2101_v18 = vpop.eup %2100  ;;  %v1530_v20 = vmax.f32 %v1456_v51, %v1457_v37  ;;  %v1210_v28 = vpop.xlane.xlu0 %1209  ;;  %v1461_v50 = vadd.f32 %v1397_v39, %v1333_v13 }
 0x369   : > { %v1271_v53 = vmul.f32 0.5, %v2101_v18  ;;  %v1201_v19 = vpop.xlane.xlu1 %1200  ;;  %v1458_v2 = vadd.f32 %v1394_v57, %v1330_v23  ;;  %v1459_v48 = vadd.f32 %v1395_v4, %v1331_v59  ;;  %2110 = vrcp.f32 %v1210_v28  ;;  %v1402_v59 = vld [vmem:[#allocation7 + $0xf0] sm:$0xff]  ;;  %v1408_v28 = vld [vmem:[#allocation7 + $0x120] sm:$0xff] }
 0x36a   : > { %v2103_v47 = vpop.eup %2102  ;;  %1531 = vmax.xlane.f32.xlu0 %v1530_v20  ;;  %2112 = vrcp.f32 %v1201_v19  ;;  %v1536_v11 = vmax.f32 %v1460_v21, %v1461_v50  ;;  %v1403_v21 = vld [vmem:[#allocation7 + $0xf8] sm:$0xff] }
 0x36b   : > { %v1334_v30 = vmul.f32 %v3015_v42, %v1271_v53  ;;  %v1335_v16 = vmul.f32 %v3019_v9, %v1271_v53  ;;  %v1273_v63 = vmul.f32 0.5, %v2103_v47  ;;  %v1533_v10 = vmax.f32 %v1458_v2, %v1459_v48 }
 0x36c   : > { %v1216_v38 = vpop.xlane.xlu0 %1215 }
 0x36d   : > { %v1336_v1 = vmul.f32 %v3029_v3, %v1273_v63  ;;  %v1337_v58 = vmul.f32 %v3031_v44, %v1273_v63  ;;  %1534 = vmax.xlane.f32.xlu1 %v1533_v10  ;;  %v1207_v34 = vpop.xlane.xlu1 %1206  ;;  %2114 = vrcp.f32 %v1216_v38  ;;  %v1462_v17 = vadd.f32 %v1398_v43, %v1334_v30  ;;  %v1409_v30 = vld [vmem:[#allocation7 + $0x128] sm:$0xff]  ;;  %v1407_v38 = vld [vmem:[#allocation7 + $0x118] sm:$0xff] }
 0x36e   : > { %v2105_v14 = vpop.eup %2104  ;;  %2116 = vrcp.f32 %v1207_v34  ;;  %1537 = vmax.xlane.f32.xlu0 %v1536_v11  ;;  %v1463_v42 = vadd.f32 %v1399_v26, %v1335_v16  ;;  %v1412_v16 = vld [vmem:[#allocation7 + $0x140] sm:$0xff]  ;;  %v1413_v63 = vld [vmem:[#allocation7 + $0x148] sm:$0xff]  ;;  %v1406_v26 = vld [vmem:[#allocation7 + $0x110] sm:$0xff] }
 0x36f   : > { %v1277_v8 = vmul.f32 0.5, %v2105_v14  ;;  %v1464_v9 = vadd.f32 %v1400_v6, %v1336_v1  ;;  %v1465_v46 = vadd.f32 %v1401_v0, %v1337_v58  ;;  %v3470_v0 = vld [vmem:[#allocation31_spill] sm:$0xff] }
 0x370   : > { %v1539_v24 = vmax.f32 %v1462_v17, %v1463_v42  ;;  %v1222_v25 = vpop.xlane.xlu0 %1221 }
 0x371   : > { %v1340_v35 = vmul.f32 %v2915_v61, %v1277_v8  ;;  %v1341_v3 = vmul.f32 %v2918_v62, %v1277_v8  ;;  %v1213_v44 = vpop.xlane.xlu1 %1212  ;;  %2118 = vrcp.f32 %v1222_v25  ;;  %v1542_v56 = vmax.f32 %v1464_v9, %v1465_v46  ;;  %v1417_v25 = vld [vmem:[#allocation7 + $0x168] sm:$0xff] }
 0x372   : > { %2120 = vrcp.f32 %v1213_v44  ;;  %1540 = vmax.xlane.f32.xlu1 %v1539_v24  ;;  %v1416_v24 = vld [vmem:[#allocation7 + $0x160] sm:$0xff]  ;;  %v1411_v44 = vld [vmem:[#allocation7 + $0x138] sm:$0xff] }
 0x373   : > { %v2107_v13 = vpop.eup %2106  ;;  %1543 = vmax.xlane.f32.xlu0 %v1542_v56  ;;  %v1468_v29 = vadd.f32 %v1404_v52, %v1340_v35  ;;  %v1469_v51 = vadd.f32 %v1405_v54, %v1341_v3  ;;  %v1410_v3 = vld [vmem:[#allocation7 + $0x130] sm:$0xff] }
 0x374   : > { %v2109_v39 = vpop.eup %2108  ;;  %v1275_v37 = vmul.f32 0.5, %v2107_v13  ;;  %v1228_v57 = vpop.xlane.xlu0 %1227 }
 0x375   : > { %v1281_v4 = vmul.f32 0.5, %v2109_v39  ;;  %v1219_v23 = vpop.xlane.xlu1 %1218  ;;  %2122 = vrcp.f32 %v1228_v57  ;;  %v1548_v61 = vmax.f32 %v1468_v29, %v1469_v51 }
 0x376   : > { %v2111_v18 = vpop.eup %2110  ;;  %v1338_v62 = vmul.f32 %v3053_v22, %v1275_v37  ;;  %v1339_v20 = vmul.f32 %v3059_v7, %v1275_v37  ;;  %2124 = vrcp.f32 %v1219_v23 }
 0x377   : > { %v2113_v50 = vpop.eup %2112  ;;  %v1344_v53 = vmul.f32 %v2946_v60, %v1281_v4  ;;  %v1345_v19 = vmul.f32 %v2948_v5, %v1281_v4  ;;  %v1285_v2 = vmul.f32 0.5, %v2111_v18  ;;  %1549 = vmax.xlane.f32.xlu0 %v1548_v61  ;;  %v1421_v61 = vld [vmem:[#allocation7 + $0x188] sm:$0xff] }
 0x378   : > { %v1279_v48 = vmul.f32 0.5, %v2113_v50  ;;  %v1466_v47 = vadd.f32 %v1402_v59, %v1338_v62  ;;  %v1467_v11 = vadd.f32 %v1403_v21, %v1339_v20  ;;  %v1234_v43 = vpop.xlane.xlu0 %1233  ;;  %v1420_v21 = vld [vmem:[#allocation7 + $0x180] sm:$0xff]  ;;  %v1415_v20 = vld [vmem:[#allocation7 + $0x158] sm:$0xff] }
 0x379   : > { %v1348_v22 = vmul.f32 %v3039_v45, %v1285_v2  ;;  %v1349_v7 = vmul.f32 %v3043_v27, %v1285_v2  ;;  %v1225_v10 = vpop.xlane.xlu1 %1224  ;;  %2126 = vrcp.f32 %v1234_v43  ;;  %v1472_v60 = vadd.f32 %v1408_v28, %v1344_v53  ;;  %v3471_v53 = vld [vmem:[#allocation19_spill] sm:$0xff] }
 0x37a   : > { %v2115_v6 = vpop.eup %2114  ;;  %v1342_v5 = vmul.f32 %v2928_v40, %v1279_v48  ;;  %v1343_v1 = vmul.f32 %v3470_v0, %v1279_v48  ;;  %2128 = vrcp.f32 %v1225_v10  ;;  %v1545_v58 = vmax.f32 %v1466_v47, %v1467_v11  ;;  %v3473_v0 = vld [vmem:[#allocation11_spill] sm:$0xff] }
 0x37b   : > { %v2117_v34 = vpop.eup %2116  ;;  %v1289_v17 = vmul.f32 0.5, %v2115_v6  ;;  %v1473_v14 = vadd.f32 %v1409_v30, %v1345_v19  ;;  %v1476_v42 = vadd.f32 %v1412_v16, %v1348_v22  ;;  %v1477_v8 = vadd.f32 %v1413_v63, %v1349_v7  ;;  %v1424_v63 = vld [vmem:[#allocation7 + $0x1a0] sm:$0xff]  ;;  %v1425_v22 = vld [vmem:[#allocation7 + $0x1a8] sm:$0xff] }
 0x37c   : > { %v1283_v45 = vmul.f32 0.5, %v2117_v34  ;;  %1546 = vmax.xlane.f32.xlu1 %v1545_v58  ;;  %v1470_v27 = vadd.f32 %v1406_v26, %v1342_v5  ;;  %v1471_v9 = vadd.f32 %v1407_v38, %v1343_v1  ;;  %v1240_v46 = vpop.xlane.xlu0 %1239  ;;  %v1418_v26 = vld [vmem:[#allocation7 + $0x170] sm:$0xff]  ;;  %v1419_v38 = vld [vmem:[#allocation7 + $0x178] sm:$0xff]  ;;  %v3472_v6 = vld [vmem:[#allocation20_spill] sm:$0xff] }
 0x37d   : > { %v1352_v52 = vmul.f32 %v3071_v15, %v1289_v17  ;;  %v1353_v40 = vmul.f32 %v3077_v41, %v1289_v17  ;;  %v1231_v54 = vpop.xlane.xlu1 %1230  ;;  %v1554_v35 = vmax.f32 %v1472_v60, %v1473_v14  ;;  %2130 = vrcp.f32 %v1240_v46  ;;  %v3474_v46 = vld [vmem:[#allocation13_spill] sm:$0xff] }
 0x37e   : > { %v2119_v56 = vpop.eup %2118  ;;  %v1346_v13 = vmul.f32 %v2954_v12, %v1283_v45  ;;  %v1347_v29 = vmul.f32 %v3027_v36, %v1283_v45  ;;  %2132 = vrcp.f32 %v1231_v54  ;;  %v1551_v51 = vmax.f32 %v1470_v27, %v1471_v9  ;;  %v1414_v36 = vld [vmem:[#allocation7 + $0x150] sm:$0xff]  ;;  %v1428_v27 = vld [vmem:[#allocation7 + $0x1c0] sm:$0xff]  ;;  %v1429_v9 = vld [vmem:[#allocation7 + $0x1c8] sm:$0xff] }
 0x37f   : > { %v2121_v39 = vpop.eup %2120  ;;  %v1293_v37 = vmul.f32 0.5, %v2119_v56  ;;  %1555 = vmax.xlane.f32.xlu0 %v1554_v35  ;;  %v1560_v57 = vmax.f32 %v1476_v42, %v1477_v8  ;;  %v1480_v4 = vadd.f32 %v1416_v24, %v1352_v52  ;;  %v1481_v15 = vadd.f32 %v1417_v25, %v1353_v40  ;;  %v3475_v25 = vld [vmem:[#allocation14_spill] sm:$0xff]  ;;  %v1422_v40 = vld [vmem:[#allocation7 + $0x190] sm:$0xff]  ;;  %v3477_v56 = vld [vmem:[#allocation15_spill] sm:$0xff] }
 0x380   : > { %v1287_v23 = vmul.f32 0.5, %v2121_v39  ;;  %1552 = vmax.xlane.f32.xlu1 %v1551_v51  ;;  %v1474_v41 = vadd.f32 %v1410_v3, %v1346_v13  ;;  %v1475_v59 = vadd.f32 %v1411_v44, %v1347_v29  ;;  %v1423_v54 = vld [vmem:[#allocation7 + $0x198] sm:$0xff]  ;;  %v3476_v3 = vld [vmem:[#allocation12_spill] sm:$0xff] }
 0x381   : > { %v1356_v18 = vmul.f32 %v3089_v49, %v1293_v37  ;;  %v1357_v12 = vmul.f32 %v3093_v33, %v1293_v37  ;;  %v1237_v62 = vpop.xlane.xlu1 %1236  ;;  %v1566_v11 = vmax.f32 %v1480_v4, %v1481_v15 }
 0x382   : > { %v2123_v28 = vpop.eup %2122  ;;  %v1350_v50 = vmul.f32 %v3063_v55, %v1287_v23  ;;  %v1351_v19 = vmul.f32 %v3471_v53, %v1287_v23  ;;  %2134 = vrcp.f32 %v1237_v62  ;;  %v1557_v2 = vmax.f32 %v1474_v41, %v1475_v59  ;;  %v1432_v59 = vld [vmem:[#allocation7 + $0x1e0] sm:$0xff]  ;;  %v3481_v53 = vld [vmem:[#allocation17_spill] sm:$0xff] }
 0x383   : > { %v2125_v48 = vpop.eup %2124  ;;  %v1297_v47 = vmul.f32 0.5, %v2123_v28  ;;  %1561 = vmax.xlane.f32.xlu0 %v1560_v57  ;;  %v1484_v43 = vadd.f32 %v1420_v21, %v1356_v18  ;;  %v1485_v30 = vadd.f32 %v1421_v61, %v1357_v12  ;;  %v1433_v21 = vld [vmem:[#allocation7 + $0x1e8] sm:$0xff]  ;;  %v3478_v61 = vld [vmem:[#allocation18_spill] sm:$0xff]  ;;  %v3479_v12 = vld [vmem:[#allocation21_spill] sm:$0xff] }
 0x384   : > { %v1291_v16 = vmul.f32 0.5, %v2125_v48  ;;  %1558 = vmax.xlane.f32.xlu1 %v1557_v2  ;;  %v1478_v49 = vadd.f32 %v1414_v36, %v1350_v50  ;;  %v1479_v33 = vadd.f32 %v1415_v20, %v1351_v19  ;;  %v1426_v36 = vld [vmem:[#allocation7 + $0x1b0] sm:$0xff]  ;;  %v1427_v20 = vld [vmem:[#allocation7 + $0x1b8] sm:$0xff]  ;;  %v3480_v28 = vld [vmem:[#allocation16_spill] sm:$0xff] }
 0x385   : > { %v1360_v7 = vmul.f32 %v3097_v31, %v1297_v47  ;;  %v1361_v55 = vmul.f32 %v3101_v32, %v1297_v47  ;;  %v1243_v10 = vpop.xlane.xlu1 %1242  ;;  %v1572_v14 = vmax.f32 %v1484_v43, %v1485_v30 }
 0x386   : > { %v2127_v60 = vpop.eup %2126  ;;  %v1354_v5 = vmul.f32 %v3472_v6, %v1291_v16  ;;  %v1355_v1 = vmul.f32 %v3473_v0, %v1291_v16  ;;  %2136 = vrcp.f32 %v1243_v10  ;;  %v1563_v58 = vmax.f32 %v1478_v49, %v1479_v33  ;;  %v1430_v33 = vld [vmem:[#allocation7 + $0x1d0] sm:$0xff] }
 0x387   : > { %v2129_v34 = vpop.eup %2128  ;;  %v1301_v17 = vmul.f32 0.5, %v2127_v60  ;;  %1567 = vmax.xlane.f32.xlu0 %v1566_v11  ;;  %v1488_v42 = vadd.f32 %v1424_v63, %v1360_v7  ;;  %v1489_v8 = vadd.f32 %v1425_v22, %v1361_v55  ;;  %v1431_v63 = vld [vmem:[#allocation7 + $0x1d8] sm:$0xff]  ;;  %v3483_v55 = vld [vmem:[#allocation23_spill] sm:$0xff] }
 0x388   : > { %v1295_v45 = vmul.f32 0.5, %v2129_v34  ;;  %1564 = vmax.xlane.f32.xlu1 %v1563_v58  ;;  %v1482_v31 = vadd.f32 %v1418_v26, %v1354_v5  ;;  %v1483_v32 = vadd.f32 %v1419_v38, %v1355_v1  ;;  %v3482_v22 = vld [vmem:[#allocation22_spill] sm:$0xff]  ;;  %v1434_v1 = vld [vmem:[#allocation7 + $0x1f0] sm:$0xff]  ;;  %v3484_v34 = vld [vmem:[#allocation24_spill] sm:$0xff] }
 0x389   : > { %v1364_v24 = vmul.f32 %v3474_v46, %v1301_v17  ;;  %v1365_v52 = vmul.f32 %v3475_v25, %v1301_v17  ;;  %v1578_v37 = vmax.f32 %v1488_v42, %v1489_v8  ;;  %v1435_v58 = vld [vmem:[#allocation7 + $0x1f8] sm:$0xff] }
 0x38a   : > { %v2131_v35 = vpop.eup %2130  ;;  %v1358_v44 = vmul.f32 %v3476_v3, %v1295_v45  ;;  %v1359_v13 = vmul.f32 %v3477_v56, %v1295_v45  ;;  %v1569_v29 = vmax.f32 %v1482_v31, %v1483_v32 }
 0x38b   : > { %v2133_v51 = vpop.eup %2132  ;;  %v1305_v39 = vmul.f32 0.5, %v2131_v35  ;;  %1573 = vmax.xlane.f32.xlu0 %v1572_v14  ;;  %v1492_v57 = vadd.f32 %v1428_v27, %v1364_v24  ;;  %v1493_v4 = vadd.f32 %v1429_v9, %v1365_v52  ;;  %v3485_v14 = vld [vmem:[#allocation25_spill] sm:$0xff]  ;;  %v3486_v27 = vmov 0.0   ;;  %v1502_v9 = vpop.xlane.xlu0 %1501 }
 0x38c   : > { %v1299_v15 = vmul.f32 0.5, %v2133_v51  ;;  %1570 = vmax.xlane.f32.xlu1 %v1569_v29  ;;  %v1486_v23 = vadd.f32 %v1422_v40, %v1358_v44  ;;  %v1487_v41 = vadd.f32 %v1423_v54, %v1359_v13  ;;  %269 = vst.msk [vmem:[#allocation2] sm:$0x1] %vm268_vm2, %v3486_v27 }
 0x38d   : > { %v1368_v18 = vmul.f32 %v3478_v61, %v1305_v39  ;;  %v1369_v62 = vmul.f32 %v3479_v12, %v1305_v39  ;;  %v1584_v47 = vmax.f32 %v1492_v57, %v1493_v4 }
 0x38e   : > { %v1362_v50 = vmul.f32 %v3480_v28, %v1299_v15  ;;  %v1363_v19 = vmul.f32 %v3481_v53, %v1299_v15  ;;  %v1575_v2 = vmax.f32 %v1486_v23, %v1487_v41 }
 0x38f   : > { %v2135_v48 = vpop.eup %2134  ;;  %1579 = vmax.xlane.f32.xlu0 %v1578_v37  ;;  %v1496_v11 = vadd.f32 %v1432_v59, %v1368_v18  ;;  %v1497_v43 = vadd.f32 %v1433_v21, %v1369_v62 }
 0x390   : > { %v1303_v30 = vmul.f32 0.5, %v2135_v48  ;;  %1576 = vmax.xlane.f32.xlu1 %v1575_v2  ;;  %v1490_v16 = vadd.f32 %v1426_v36, %v1362_v50  ;;  %v1491_v49 = vadd.f32 %v1427_v20, %v1363_v19 }
 0x391   : > { %v1590_v60 = vmax.f32 %v1496_v11, %v1497_v43 }
 0x392   : > { %v1366_v7 = vmul.f32 %v3482_v22, %v1303_v30  ;;  %v1367_v10 = vmul.f32 %v3483_v55, %v1303_v30  ;;  %v1581_v26 = vmax.f32 %v1490_v16, %v1491_v49 }
 0x393   : > { %v2137_v38 = vpop.eup %2136  ;;  %1585 = vmax.xlane.f32.xlu0 %v1584_v47 }
 0x394   : > { %v1307_v6 = vmul.f32 0.5, %v2137_v38  ;;  %1582 = vmax.xlane.f32.xlu1 %v1581_v26  ;;  %v1494_v5 = vadd.f32 %v1430_v33, %v1366_v7  ;;  %v1495_v0 = vadd.f32 %v1431_v63, %v1367_v10 }
 0x396   : > { %v1370_v17 = vmul.f32 %v3484_v34, %v1307_v6  ;;  %v1371_v42 = vmul.f32 %v3485_v14, %v1307_v6  ;;  %v1587_v8 = vmax.f32 %v1494_v5, %v1495_v0 }
 0x397   : > { %1591 = vmax.xlane.f32.xlu0 %v1590_v60 }
 0x398   : > { %1588 = vmax.xlane.f32.xlu1 %v1587_v8  ;;  %v1498_v45 = vadd.f32 %v1434_v1, %v1370_v17  ;;  %v1499_v31 = vadd.f32 %v1435_v58, %v1371_v42 }
 0x39a   : > { %v1593_v32 = vmax.f32 %v1498_v45, %v1499_v31 }
 0x39c   : > { %1594 = vmax.xlane.f32.xlu1 %v1593_v32 }
 0x3b0   : > { %v1505_v24 = vpop.xlane.xlu1 %1504 }
 0x3b1   : > { %v1597_v52 = vadd.f32 %v1505_v24, %v1502_v9 }
 0x3b4   : > { %v1508_v46 = vpop.xlane.xlu0 %1507 }
 0x3b5   : > { %v1598_v54 = vadd.f32 %v1597_v52, %v1508_v46  ;;  %v1596_v52 = vld [vmem:[#allocation2] sm:$0x1] }
 0x3bc   : > { %v1511_v40 = vpop.xlane.xlu1 %1510 }
 0x3bd   : > { %v1599_v3 = vadd.f32 %v1598_v54, %v1511_v40 }
 0x3ca   : > { %v1514_v25 = vpop.xlane.xlu0 %1513 }
 0x3cb   : > { %v1600_v56 = vadd.f32 %v1599_v3, %v1514_v25 }
 0x3ce   : > { %v1517_v44 = vpop.xlane.xlu1 %1516 }
 0x3cf   : > { %v1601_v29 = vadd.f32 %v1600_v56, %v1517_v44 }
 0x3d4   : > { %v1520_v35 = vpop.xlane.xlu0 %1519 }
 0x3d5   : > { %v1602_v39 = vadd.f32 %v1601_v29, %v1520_v35 }
 0x3dc   : > { %v1523_v51 = vpop.xlane.xlu1 %1522 }
 0x3dd   : > { %v1603_v57 = vadd.f32 %v1602_v39, %v1523_v51 }
 0x3ea   : > { %v1526_v13 = vpop.xlane.xlu0 %1525 }
 0x3eb   : > { %v1604_v15 = vadd.f32 %v1603_v57, %v1526_v13 }
 0x3ee   : > { %v1529_v4 = vpop.xlane.xlu1 %1528 }
 0x3ef   : > { %v1605_v41 = vadd.f32 %v1604_v15, %v1529_v4 }
 0x3f3   : > { %v1532_v37 = vpop.xlane.xlu0 %1531 }
 0x3f4   : > { %v1606_v21 = vadd.f32 %v1605_v41, %v1532_v37 }
 0x3f6   : > { %v1535_v59 = vpop.xlane.xlu1 %1534 }
 0x3f7   : > { %v1538_v23 = vpop.xlane.xlu0 %1537  ;;  %v1607_v18 = vadd.f32 %v1606_v21, %v1535_v59 }
 0x3f9   : > { %v1608_v62 = vadd.f32 %v1607_v18, %v1538_v23 }
 0x3fb   : > { %v1541_v12 = vpop.xlane.xlu1 %1540 }
 0x3fc   : > { %v1544_v61 = vpop.xlane.xlu0 %1543  ;;  %v1609_v36 = vadd.f32 %v1608_v62, %v1541_v12 }
 0x3fe   : > { %v1610_v28 = vadd.f32 %v1609_v36, %v1544_v61 }
 0x400   : > { %v1550_v20 = vpop.xlane.xlu0 %1549 }
 0x405   : > { %v1547_v50 = vpop.xlane.xlu1 %1546 }
 0x406   : > { %v1611_v53 = vadd.f32 %v1610_v28, %v1547_v50 }
 0x408   : > { %v1612_v19 = vadd.f32 %v1611_v53, %v1550_v20  ;;  %v1556_v2 = vpop.xlane.xlu0 %1555 }
 0x409   : > { %v1553_v48 = vpop.xlane.xlu1 %1552 }
 0x40a   : > { %v1613_v47 = vadd.f32 %v1612_v19, %v1553_v48 }
 0x40c   : > { %v1614_v11 = vadd.f32 %v1613_v47, %v1556_v2  ;;  %v1562_v43 = vpop.xlane.xlu0 %1561 }
 0x40d   : > { %v1559_v30 = vpop.xlane.xlu1 %1558 }
 0x40e   : > { %v1615_v16 = vadd.f32 %v1614_v11, %v1559_v30 }
 0x410   : > { %v1616_v49 = vadd.f32 %v1615_v16, %v1562_v43  ;;  %v1568_v33 = vpop.xlane.xlu0 %1567 }
 0x411   : > { %v1565_v63 = vpop.xlane.xlu1 %1564 }
 0x412   : > { %v1617_v22 = vadd.f32 %v1616_v49, %v1565_v63 }
 0x414   : > { %v1618_v7 = vadd.f32 %v1617_v22, %v1568_v33  ;;  %v1574_v55 = vpop.xlane.xlu0 %1573 }
 0x415   : > { %v1571_v10 = vpop.xlane.xlu1 %1570 }
 0x416   : > { %v1619_v26 = vadd.f32 %v1618_v7, %v1571_v10 }
 0x418   : > { %v1620_v38 = vadd.f32 %v1619_v26, %v1574_v55  ;;  %v1580_v60 = vpop.xlane.xlu0 %1579 }
 0x419   : > { %v1577_v6 = vpop.xlane.xlu1 %1576 }
 0x41a   : > { %v1621_v5 = vadd.f32 %v1620_v38, %v1577_v6 }
 0x41c   : > { %v1622_v0 = vadd.f32 %v1621_v5, %v1580_v60  ;;  %v1586_v58 = vpop.xlane.xlu0 %1585 }
 0x41d   : > { %v1583_v1 = vpop.xlane.xlu1 %1582 }
 0x41e   : > { %v1623_v34 = vadd.f32 %v1622_v0, %v1583_v1 }
 0x420   : > { %v1624_v17 = vadd.f32 %v1623_v34, %v1586_v58  ;;  %v1592_v8 = vpop.xlane.xlu0 %1591 }
 0x421   : > { %v1589_v14 = vpop.xlane.xlu1 %1588 }
 0x422   : > { %v1625_v42 = vadd.f32 %v1624_v17, %v1589_v14 }
 0x424   : > { %v1626_v45 = vadd.f32 %v1625_v42, %v1592_v8 }
 0x425   : > { %v1595_v31 = vpop.xlane.xlu1 %1594 }
 0x426   : > { %v1627_v32 = vadd.f32 %v1626_v45, %v1595_v31 }
 0x428   : > { %v1628_v27 = vrot.slane %v1627_v32, 4 }
 0x42a   : > { %v1629_v9 = vadd.f32 %v1628_v27, %v1627_v32 }
 0x42c   : > { %v1630_v46 = vrot.slane %v1629_v9, 2 }
 0x42e   : > { %v1631_v24 = vadd.f32 %v1630_v46, %v1629_v9 }
 0x430   : > { %v1632_v25 = vrot.slane %v1631_v24, 1 }
 0x432   : > { %v1633_v40 = vadd.f32 %v1632_v25, %v1631_v24 }
 0x434   : > { %v1634_v54 = vadd.f32 %v1633_v40, %v1596_v52 }
 0x436   : > { %1636 = vst.msk [vmem:[#allocation2] sm:$0x1] %vm268_vm2, %v1634_v54 }
 0x43d   : > { %v1640_v35 = vld [vmem:[#allocation2] sm:$0x1] }
 0x43e   : > { %v1641_v3 = vmul.f32 0.00390625, %v1640_v35 }
 0x440   : > { %v1642_v44 = vadd.f32 1e-05, %v1641_v3 }
 0x442   : > { %2138 = vlog2.f32 %v1642_v44 }
 0x44f   : > { %v2139_v56 = vpop.eup %2138 }
 0x450   : > { %v1644_v13 = vmul.f32 0.6931472, %v2139_v56 }
 0x452   : > { %v1645_v29 = vsub.f32 0.0, %v1644_v13 }
 0x454   : > { %1646 = vst.msk [vmem:[%s263_s20] sm:$0x1] %vm268_vm2, %v1645_v29 }
 0x455 PF: > { %s19_s17 = sadd.s32 1, %s2280_s17   ;;  %s3487_s12 = smov %s2264_s13 }
 0x456   : > { %p16_p4 = scmp.ge.s32.totalorder %s19_s17, 4   ;;  %s3488_s13 = smov %s2268_s14 }
 0x457   : > { %s3489_s14 = smov %s2384_s9  ;;  %s3490_s15 = smov %s2276_s16 }
 0x458   : > { %s3491_s16 = smov %s3493_s25  ;;  %18 = sbr.rel (!%p16_p4) target bundleno = 6 (0x6), region = 98 }
 0x45d   :  { %1664 = vsyncpa [#allocation4], 1 }
 0x45e   :  { %1666 = vsyncpa [#allocation4 + $0x1], 1 }
 0x45f   :  { %1667 = vsyncpa [#allocation6], 1 }
 0x460   :  { %1669 = vsyncpa [#allocation6 + $0x1], 1 }

</bundles_post_ra>
